<compile_context>
chip_gen: v6e
topology: v6e:2x2x1
jax: 0.10.0
libtpu: 0.0.40
codegen_flags: <defaults>
</compile_context>

<pallas_src>
import jax
import jax.numpy as jnp
from jax.experimental import pallas as pl
from jax.experimental.pallas import tpu as pltpu


# ------------------------------------------------------------------------------ kernel
def temporal_fusion_kernel(
    seg_ref,     # (Bt, N)          0/1 one-hot segment matrix (compute dtype), resident
    invc_ref,    # (Bt, 1)   f32    1 / node-count per graph, resident
    z_ref,       # (Tt, N, Dz)      node embeddings for Tt steps (streamed)
    u_ref,       # (Tt, Bt, Dg_in)  global features for Tt steps (streamed)
    wg_ref,      # (Dg_in, Dg)      global_proj weight (pre-transposed), resident
    bg_ref,      # (1, Dg)   f32
    wihz_ref,    # (Dz, 3H)         GRU weight_ih, graph half, resident
    wihg_ref,    # (Dg, 3H)         GRU weight_ih, global half, resident
    whh_ref,     # (H, 3H)          GRU weight_hh, resident
    bih_ref,     # (1, 3H)   f32
    bhh_ref,     # (1, 3H)   f32
    h0_ref,      # (Bt, H)   f32    initial hidden state, resident
    hs_ref,      # out: (Tt, Bt, H) f32 hidden state after each of the Tt steps
    h_state,     # scratch: (Bt, H) f32 carry across grid iterations along t
):
    Tt = z_ref.shape[0]
    H = whh_ref.shape[0]
    cdt = wihz_ref.dtype                    # matmul operand dtype (bf16 or f32)

    @pl.when(pl.program_id(1) == 0)          # new rollout (per B-tile): load h0
    def _():
        h_state[...] = h0_ref[...]

    # ---------------- h-independent part, hoisted out of the recurrence ----------------
    seg = seg_ref[...]
    invc = invc_ref[...]
    wg = wg_ref[...]
    bg = bg_ref[...]
    wihz = wihz_ref[...]
    wihg = wihg_ref[...]
    bih = bih_ref[...]

    gi_steps = []
    for i in range(Tt):                      # static unroll, no h dependence
        # 1) mean readout: exact 0/1 segment sum * f32 reciprocal count
        ge = jnp.dot(seg, z_ref[i], preferred_element_type=jnp.float32) * invc
        # 2) global projection + ReLU
        gl = jnp.maximum(
            jnp.dot(u_ref[i], wg, preferred_element_type=jnp.float32) + bg, 0.0)
        # 3) gi = [graph || glob] @ wih + bih, without materializing the concat
        gi_steps.append(
            jnp.dot(ge.astype(cdt), wihz, preferred_element_type=jnp.float32)
            + jnp.dot(gl.astype(cdt), wihg, preferred_element_type=jnp.float32)
            + bih
        )

    # ---------------- sequential GRU recurrence over the Tt in-VMEM steps --------------
    whh = whh_ref[...]
    bhh = bhh_ref[...]
    h = h_state[...]                          # f32, lives in vregs across the unroll
    # static unroll (Tt is a small trace-time constant; equivalent to
    # lax.fori_loop(..., unroll=True) but with static gate-slice offsets)
    for i in range(Tt):
        gi = gi_steps[i]                                              # (Bt, 3H) f32
        gh = jnp.dot(h.astype(cdt), whh,
                     preferred_element_type=jnp.float32) + bhh        # (Bt, 3H) f32
        r = jax.nn.sigmoid(gi[:, 0 * H:1 * H] + gh[:, 0 * H:1 * H])
        zg = jax.nn.sigmoid(gi[:, 1 * H:2 * H] + gh[:, 1 * H:2 * H])
        n = jnp.tanh(gi[:, 2 * H:3 * H] + r * gh[:, 2 * H:3 * H])
        h = (1.0 - zg) * n + zg * h
        hs_ref[i] = h.astype(hs_ref.dtype)
    h_state[...] = h                          # carry to the next grid iteration


# ----------------------------------------------------------------------------- wrapper
def temporal_fusion(z_seq, u_seq, batch, batch_size, prev_h, params,
                    compute_dtype=jnp.bfloat16, t_block=8, b_tile=None, z_buffers=2):
    """T-step rollout of TemporalFusion (mode='graph', GRUCell, mean readout).

    z_seq : (T, N, Dz), u_seq : (T, B, Dg_in), batch : (N,) graph id per node,
    prev_h : (B, H).  Returns hs : (T, B, H) f32 — the GRU hidden state after every
    step (the torch module's per-step return value is (h, h, None)).
    """
    T, N, Dz = z_seq.shape
    B = batch_size
    H = prev_h.shape[-1]
    Dg_in = u_seq.shape[-1]
    Dg = params["wg"].shape[1]
    cdt = compute_dtype

    # ---- time tiling: Tt steps per grid iteration (pad T to a multiple of Tt; padded
    # steps run on zeros and are sliced away below — pick t_block | T to avoid it).
    Tt = min(int(t_block), T)
    nt = pl.cdiv(T, Tt)
    Tp = nt * Tt
    if Tp != T:
        z_seq = jnp.concatenate([z_seq, jnp.zeros((Tp - T, N, Dz), z_seq.dtype)], 0)
        u_seq = jnp.concatenate([u_seq, jnp.zeros((Tp - T, B, Dg_in), u_seq.dtype)], 0)

    # ---- batch tiling (v7x megacore): per-graph recurrences are independent.  A single
    # tile is used by default; pass b_tile (a multiple of 8) to split large B.
    Bt = B if b_tile is None else int(b_tile)
    assert B % Bt == 0, "b_tile must divide batch_size"
    nb = B // Bt

    # ---- mean readout = 0/1 one-hot segment sum (exact in bf16) * f32 1/count.
    one_hot = (batch[None, :] == jnp.arange(B, dtype=batch.dtype)[:, None])
    counts = one_hot.sum(axis=1, keepdims=True).astype(jnp.float32)
    inv_counts = 1.0 / jnp.maximum(counts, 1.0)      # (B, 1); empty graphs -> zero rows
    seg = one_hot.astype(cdt)                        # (B, N)

    # ---- operand casts; wih is split into its graph / global halves (no in-kernel concat)
    z_c = z_seq.astype(cdt)
    u_c = u_seq.astype(cdt)
    wg_c = params["wg"].astype(cdt)
    wih_z = params["wih"][:Dz].astype(cdt)           # (Dz, 3H)
    wih_g = params["wih"][Dz:].astype(cdt)           # (Dg, 3H)
    whh_c = params["whh"].astype(cdt)                # (H, 3H)
    bg = params["bg"].astype(jnp.float32)
    bih = params["bih"].astype(jnp.float32)
    bhh = params["bhh"].astype(jnp.float32)
    h0 = prev_h.astype(jnp.float32)

    res1 = pl.Buffered(1)        # constant / per-B-tile resident blocks: 1 VMEM buffer

    def wspec(shape):            # weights & biases: same block at every grid point
        return pl.BlockSpec(shape, lambda b, t: (0,) * len(shape), pipeline_mode=res1)

    in_specs = [
        pl.BlockSpec((Bt, N), lambda b, t: (b, 0), pipeline_mode=res1),       # seg
        pl.BlockSpec((Bt, 1), lambda b, t: (b, 0), pipeline_mode=res1),       # 1/counts
        pl.BlockSpec((Tt, N, Dz), lambda b, t: (t, 0, 0),
                     pipeline_mode=pl.Buffered(int(z_buffers))),              # z (streamed)
        pl.BlockSpec((Tt, Bt, Dg_in), lambda b, t: (t, b, 0)),                # u (streamed)
        wspec((Dg_in, Dg)),                                                   # wg
        wspec((1, Dg)),                                                       # bg
        wspec((Dz, 3 * H)),                                                   # wih_z
        wspec((Dg, 3 * H)),                                                   # wih_g
        wspec((H, 3 * H)),                                                    # whh
        wspec((1, 3 * H)),                                                    # bih
        wspec((1, 3 * H)),                                                    # bhh
        pl.BlockSpec((Bt, H), lambda b, t: (b, 0), pipeline_mode=res1),       # h0
    ]
    out_specs = pl.BlockSpec((Tt, Bt, H), lambda b, t: (t, b, 0))

    # ---- explicit scoped-VMEM budget (default scoped limit is only 16/32 MiB).
    isz = jnp.dtype(cdt).itemsize

    def nbytes(shape, itemsize, bufs=1):
        n = 1
        for s in shape:
            n *= s
        return n * itemsize * bufs

    est = (
        nbytes((Bt, N), isz) + nbytes((Bt, 1), 4)
        + nbytes((Tt, N, Dz), isz, int(z_buffers)) + nbytes((Tt, Bt, Dg_in), isz, 2)
        + nbytes((Dg_in, Dg), isz) + nbytes((1, Dg), 4)
        + nbytes((Dz, 3 * H), isz) + nbytes((Dg, 3 * H), isz) + nbytes((H, 3 * H), isz)
        + 2 * nbytes((1, 3 * H), 4)
        + nbytes((Bt, H), 4)
        + nbytes((Tt, Bt, H), 4, 2)          # output double buffer
        + nbytes((Bt, H), 4)                 # h_state scratch
    )
    vmem_limit = int(min(max(4 * est + (1 << 20), 16 << 20), 64 << 20))

    flops = 2 * Tp * (B * N * Dz + B * Dg_in * Dg
                      + B * (Dz + Dg) * 3 * H + B * H * 3 * H)
    bytes_accessed = (
        Tp * N * Dz * isz + Tp * B * Dg_in * isz + Tp * B * H * 4
        + (B * N + Dg_in * Dg + (Dz + Dg + H) * 3 * H) * isz
        + (B + Dg + 2 * 3 * H + B * H) * 4
    )
    transcendentals = 3 * Tp * B * H

    hs = pl.pallas_call(
        temporal_fusion_kernel,
        out_shape=jax.ShapeDtypeStruct((Tp, B, H), jnp.float32),
        grid_spec=pltpu.PrefetchScalarGridSpec(
            num_scalar_prefetch=0,
            grid=(nb, nt),
            in_specs=in_specs,
            out_specs=out_specs,
            scratch_shapes=[pltpu.VMEM((Bt, H), jnp.float32)],
        ),
        compiler_params=pltpu.CompilerParams(
            # B-tiles are independent ("parallel" -> feeds v7x's 2nd TensorCore);
            # the time axis carries the hidden state -> "arbitrary".
            dimension_semantics=("parallel", "arbitrary"),
            vmem_limit_bytes=vmem_limit,
        ),
        cost_estimate=pl.CostEstimate(
            flops=int(flops),
            bytes_accessed=int(bytes_accessed),
            transcendentals=int(transcendentals),
        ),
    )(seg, inv_counts, z_c, u_c, wg_c, bg, wih_z, wih_g, whh_c, bih, bhh, h0)

    return hs if Tp == T else hs[:T]


def temporal_fusion_step(z, u, batch, batch_size, prev_h, params,
                         compute_dtype=jnp.bfloat16):
    """Single-step call matching the torch module's forward: returns (h, h, None)."""
    hs = temporal_fusion(z[None], u[None], batch, batch_size, prev_h, params,
                         compute_dtype=compute_dtype)
    h = hs[0]
    return h, h, None


# --------------------------------------------------------------------- params / reference
def init_params(key, backbone_dout, glob_din, glob_dout, rnn_dout):
    rnn_din = backbone_dout + glob_dout
    ks = jax.random.split(key, 6)
    scale = 0.1
    return {
        # global_proj: Linear(glob_din, glob_dout); stored pre-transposed (din, dout)
        "wg": scale * jax.random.normal(ks[0], (glob_din, glob_dout), jnp.float32),
        "bg": scale * jax.random.normal(ks[1], (1, glob_dout), jnp.float32),
        # GRUCell(input_size=rnn_din, hidden_size=rnn_dout); pre-transposed (din, 3H)
        "wih": scale * jax.random.normal(ks[2], (rnn_din, 3 * rnn_dout), jnp.float32),
        "whh": scale * jax.random.normal(ks[3], (rnn_dout, 3 * rnn_dout), jnp.float32),
        "bih": scale * jax.random.normal(ks[4], (1, 3 * rnn_dout), jnp.float32),
        "bhh": scale * jax.random.normal(ks[5], (1, 3 * rnn_dout), jnp.float32),
    }


def ref_forward_seq(z_seq, u_seq, batch, batch_size, prev_h, params):
    """Plain-JAX (f32) reference of the torch forward, scanned over T steps."""
    B = batch_size
    H = prev_h.shape[-1]
    one_hot = (batch[None, :] == jnp.arange(B, dtype=batch.dtype)[:, None]).astype(jnp.float32)
    seg = one_hot / jnp.maximum(one_hot.sum(axis=1, keepdims=True), 1.0)

    def step(h, zu):
        z, u = zu
        graph_emb = seg @ z
        glob_emb = jax.nn.relu(u @ params["wg"] + params["bg"])
        fused = jnp.concatenate([graph_emb, glob_emb], axis=-1)
        gi = fused @ params["wih"] + params["bih"]
        gh = h @ params["whh"] + params["bhh"]
        r = jax.nn.sigmoid(gi[:, :H] + gh[:, :H])
        zg = jax.nn.sigmoid(gi[:, H:2 * H] + gh[:, H:2 * H])
        n = jnp.tanh(gi[:, 2 * H:] + r * gh[:, 2 * H:])
        h_new = (1.0 - zg) * n + zg * h
        return h_new, h_new

    h_last, hs = jax.lax.scan(step, prev_h, (z_seq, u_seq))
    return hs, h_last


# -------------------------------------------------------------------------- demo / check
if __name__ == "__main__":
    batch_size = 2
    nodes_per_graph = 8
    num_nodes = batch_size * nodes_per_graph   # 16
    backbone_dout = 32       # node / graph embedding dim (z)
    glob_din = 16            # raw global feature dim (u)
    glob_dout = 32           # projected global dim
    rnn_dout = 32            # GRU hidden size
    T = 8                    # time steps

    key = jax.random.PRNGKey(0)
    kz, ku, kh = jax.random.split(key, 3)
    z_seq = jax.random.normal(kz, (T, num_nodes, backbone_dout), jnp.float32)
    u_seq = jax.random.normal(ku, (T, batch_size, glob_din), jnp.float32)
    prev_h = jax.random.normal(kh, (batch_size, rnn_dout), jnp.float32)
    batch = jnp.repeat(jnp.arange(batch_size, dtype=jnp.int32), nodes_per_graph)

    params = init_params(jax.random.PRNGKey(42), backbone_dout, glob_din,
                         glob_dout, rnn_dout)

    # plain-JAX reference
    hs_ref, _ = ref_forward_seq(z_seq, u_seq, batch, batch_size, prev_h, params)

    # default bf16 matmul operands; t_block=3 -> Tt=3, nt=3: exercises the T-padding
    # path AND the cross-grid-iteration hidden-state carry.
    hs_bf16 = temporal_fusion(z_seq, u_seq, batch, batch_size, prev_h, params, t_block=3)
    jax.block_until_ready(hs_bf16)
    assert hs_bf16.shape == (T, batch_size, rnn_dout)
    assert jnp.allclose(hs_bf16, hs_ref, atol=5e-2, rtol=5e-2), "bf16 rollout mismatch"

    # f32 operands, whole rollout in a single grid iteration (Tt = T) -> tight check.
    hs_f32 = temporal_fusion(z_seq, u_seq, batch, batch_size, prev_h, params,
                             compute_dtype=jnp.float32)
    jax.block_until_ready(hs_f32)
    assert jnp.allclose(hs_f32, hs_ref, atol=5e-4, rtol=5e-4), "f32 rollout mismatch"

    # single-step call with the torch module's (h, h, None) return convention.
    h1, h1b, c1 = temporal_fusion_step(z_seq[0], u_seq[0], batch, batch_size,
                                       prev_h, params, compute_dtype=jnp.float32)
    jax.block_until_ready(h1)
    assert c1 is None
    assert jnp.allclose(h1, h1b)
    assert jnp.allclose(h1, hs_ref[0], atol=5e-4, rtol=5e-4), "single-step mismatch"

    print("KERNEL_OK")
</pallas_src>

<mosaic_0001>
module attributes {stable_mosaic.version = 11 : i64} {
  func.func @temporal_fusion_kernel(%arg0: i32, %arg1: i32, %arg2: memref<2x16xbf16, #tpu.memory_space<vmem>>, %arg3: memref<2x1xf32, #tpu.memory_space<vmem>>, %arg4: memref<3x16x32xbf16, #tpu.memory_space<vmem>>, %arg5: memref<3x2x16xbf16, #tpu.memory_space<vmem>>, %arg6: memref<16x32xbf16, #tpu.memory_space<vmem>>, %arg7: memref<1x32xf32, #tpu.memory_space<vmem>>, %arg8: memref<32x96xbf16, #tpu.memory_space<vmem>>, %arg9: memref<32x96xbf16, #tpu.memory_space<vmem>>, %arg10: memref<32x96xbf16, #tpu.memory_space<vmem>>, %arg11: memref<1x96xf32, #tpu.memory_space<vmem>>, %arg12: memref<1x96xf32, #tpu.memory_space<vmem>>, %arg13: memref<2x32xf32, #tpu.memory_space<vmem>>, %arg14: memref<3x2x32xf32, #tpu.memory_space<vmem>>, %arg15: memref<2x32xf32, #tpu.memory_space<vmem>>) attributes {dimension_semantics = [#tpu.dimension_semantics<parallel>, #tpu.dimension_semantics<arbitrary>], iteration_bounds = array<i64: 1, 3>, scalar_prefetch = 0 : i64, scratch_operands = 1 : i64, tpu.core_type = #tpu.core_type<tc>, window_params = [{pipeline_mode = #tpu.pipeline_mode<synchronous>, transform_indices = @transform_0, window_bounds = array<i64: 2, 16>}, {pipeline_mode = #tpu.pipeline_mode<synchronous>, transform_indices = @transform_1, window_bounds = array<i64: 2, 1>}, {pipeline_mode = #tpu.pipeline_mode<double_buffered>, transform_indices = @transform_2, window_bounds = array<i64: 3, 16, 32>}, {transform_indices = @transform_3, window_bounds = array<i64: 3, 2, 16>}, {pipeline_mode = #tpu.pipeline_mode<synchronous>, transform_indices = @transform_4, window_bounds = array<i64: 16, 32>}, {pipeline_mode = #tpu.pipeline_mode<synchronous>, transform_indices = @transform_5, window_bounds = array<i64: 1, 32>}, {pipeline_mode = #tpu.pipeline_mode<synchronous>, transform_indices = @transform_6, window_bounds = array<i64: 32, 96>}, {pipeline_mode = #tpu.pipeline_mode<synchronous>, transform_indices = @transform_7, window_bounds = array<i64: 32, 96>}, {pipeline_mode = #tpu.pipeline_mode<synchronous>, transform_indices = @transform_8, window_bounds = array<i64: 32, 96>}, {pipeline_mode = #tpu.pipeline_mode<synchronous>, transform_indices = @transform_9, window_bounds = array<i64: 1, 96>}, {pipeline_mode = #tpu.pipeline_mode<synchronous>, transform_indices = @transform_10, window_bounds = array<i64: 1, 96>}, {pipeline_mode = #tpu.pipeline_mode<synchronous>, transform_indices = @transform_11, window_bounds = array<i64: 2, 32>}, {transform_indices = @transform_12, window_bounds = array<i64: 3, 2, 32>}]} {
    %c0_i32 = arith.constant 0 : i32
    %0 = arith.cmpi eq, %arg1, %c0_i32 : i32
    %1 = arith.extui %0 : i1 to i32
    %c0_i32_0 = arith.constant 0 : i32
    %2 = arith.cmpi ne, %1, %c0_i32_0 : i32
    scf.if %2 {
      %c0_73 = arith.constant 0 : index
      %c0_74 = arith.constant 0 : index
      %170 = vector.load %arg13[%c0_73, %c0_74] : memref<2x32xf32, #tpu.memory_space<vmem>>, vector<2x32xf32>
      %c0_75 = arith.constant 0 : index
      %c0_76 = arith.constant 0 : index
      %171 = vector.load %arg15[%c0_75, %c0_76] : memref<2x32xf32, #tpu.memory_space<vmem>>, vector<2x32xf32>
      tpu.vector_store %arg15[%c0_75, %c0_76], %170 {strides = array<i32>} : memref<2x32xf32, #tpu.memory_space<vmem>>, vector<2x32xf32>,
    } else {
    }
    %c0 = arith.constant 0 : index
    %c0_1 = arith.constant 0 : index
    %3 = vector.load %arg2[%c0, %c0_1] : memref<2x16xbf16, #tpu.memory_space<vmem>>, vector<2x16xbf16>
    %c0_2 = arith.constant 0 : index
    %c0_3 = arith.constant 0 : index
    %4 = vector.load %arg3[%c0_2, %c0_3] : memref<2x1xf32, #tpu.memory_space<vmem>>, vector<2x1xf32>
    %c0_4 = arith.constant 0 : index
    %c0_5 = arith.constant 0 : index
    %5 = vector.load %arg6[%c0_4, %c0_5] : memref<16x32xbf16, #tpu.memory_space<vmem>>, vector<16x32xbf16>
    %c0_6 = arith.constant 0 : index
    %c0_7 = arith.constant 0 : index
    %6 = vector.load %arg7[%c0_6, %c0_7] : memref<1x32xf32, #tpu.memory_space<vmem>>, vector<1x32xf32>
    %c0_8 = arith.constant 0 : index
    %c0_9 = arith.constant 0 : index
    %7 = vector.load %arg8[%c0_8, %c0_9] : memref<32x96xbf16, #tpu.memory_space<vmem>>, vector<32x96xbf16>
    %c0_10 = arith.constant 0 : index
    %c0_11 = arith.constant 0 : index
    %8 = vector.load %arg9[%c0_10, %c0_11] : memref<32x96xbf16, #tpu.memory_space<vmem>>, vector<32x96xbf16>
    %c0_12 = arith.constant 0 : index
    %c0_13 = arith.constant 0 : index
    %9 = vector.load %arg11[%c0_12, %c0_13] : memref<1x96xf32, #tpu.memory_space<vmem>>, vector<1x96xf32>
    %c0_14 = arith.constant 0 : index
    %c0_15 = arith.constant 0 : index
    %c0_16 = arith.constant 0 : index
    %10 = vector.load %arg4[%c0_14, %c0_15, %c0_16] : memref<3x16x32xbf16, #tpu.memory_space<vmem>>, vector<1x16x32xbf16>
    %11 = vector.shape_cast %10 : vector<1x16x32xbf16> to vector<16x32xbf16>
    %cst = arith.constant dense<0.000000e+00> : vector<2x32xf32>
    %12 = tpu.matmul %3, %11, %cst {dimension_numbers = #tpu.dot_dimension_numbers<[1], [0], [0], [1], [0, 0, 1, 1], [], []>} : vector<2x16xbf16>, vector<16x32xbf16>, vector<2x32xf32> -> vector<2x32xf32>
    %13 = vector.broadcast %4 : vector<2x1xf32> to vector<2x32xf32>
    %14 = arith.mulf %12, %13 : vector<2x32xf32>
    %c0_17 = arith.constant 0 : index
    %c0_18 = arith.constant 0 : index
    %c0_19 = arith.constant 0 : index
    %15 = vector.load %arg5[%c0_17, %c0_18, %c0_19] : memref<3x2x16xbf16, #tpu.memory_space<vmem>>, vector<1x2x16xbf16>
    %16 = vector.shape_cast %15 : vector<1x2x16xbf16> to vector<2x16xbf16>
    %cst_20 = arith.constant dense<0.000000e+00> : vector<2x32xf32>
    %17 = tpu.matmul %16, %5, %cst_20 {dimension_numbers = #tpu.dot_dimension_numbers<[1], [0], [0], [1], [0, 0, 1, 1], [], []>} : vector<2x16xbf16>, vector<16x32xbf16>, vector<2x32xf32> -> vector<2x32xf32>
    %18 = vector.broadcast %6 : vector<1x32xf32> to vector<2x32xf32>
    %19 = arith.addf %17, %18 : vector<2x32xf32>
    %cst_21 = arith.constant 0.000000e+00 : f32
    %20 = vector.broadcast %cst_21 : f32 to vector<2x32xf32>
    %21 = arith.maximumf %19, %20 : vector<2x32xf32>
    %22 = arith.truncf %14 : vector<2x32xf32> to vector<2x32xbf16>
    %cst_22 = arith.constant dense<0.000000e+00> : vector<2x96xf32>
    %23 = tpu.matmul %22, %7, %cst_22 {dimension_numbers = #tpu.dot_dimension_numbers<[1], [0], [0], [1], [0, 0, 1, 1], [], []>} : vector<2x32xbf16>, vector<32x96xbf16>, vector<2x96xf32> -> vector<2x96xf32>
    %24 = arith.truncf %21 : vector<2x32xf32> to vector<2x32xbf16>
    %cst_23 = arith.constant dense<0.000000e+00> : vector<2x96xf32>
    %25 = tpu.matmul %24, %8, %cst_23 {dimension_numbers = #tpu.dot_dimension_numbers<[1], [0], [0], [1], [0, 0, 1, 1], [], []>} : vector<2x32xbf16>, vector<32x96xbf16>, vector<2x96xf32> -> vector<2x96xf32>
    %26 = arith.addf %23, %25 : vector<2x96xf32>
    %27 = vector.broadcast %9 : vector<1x96xf32> to vector<2x96xf32>
    %28 = arith.addf %26, %27 : vector<2x96xf32>
    %c1 = arith.constant 1 : index
    %c0_24 = arith.constant 0 : index
    %c0_25 = arith.constant 0 : index
    %29 = vector.load %arg4[%c1, %c0_24, %c0_25] : memref<3x16x32xbf16, #tpu.memory_space<vmem>>, vector<1x16x32xbf16>
    %30 = vector.shape_cast %29 : vector<1x16x32xbf16> to vector<16x32xbf16>
    %cst_26 = arith.constant dense<0.000000e+00> : vector<2x32xf32>
    %31 = tpu.matmul %3, %30, %cst_26 {dimension_numbers = #tpu.dot_dimension_numbers<[1], [0], [0], [1], [0, 0, 1, 1], [], []>} : vector<2x16xbf16>, vector<16x32xbf16>, vector<2x32xf32> -> vector<2x32xf32>
    %32 = vector.broadcast %4 : vector<2x1xf32> to vector<2x32xf32>
    %33 = arith.mulf %31, %32 : vector<2x32xf32>
    %c1_27 = arith.constant 1 : index
    %c0_28 = arith.constant 0 : index
    %c0_29 = arith.constant 0 : index
    %34 = vector.load %arg5[%c1_27, %c0_28, %c0_29] : memref<3x2x16xbf16, #tpu.memory_space<vmem>>, vector<1x2x16xbf16>
    %35 = vector.shape_cast %34 : vector<1x2x16xbf16> to vector<2x16xbf16>
    %cst_30 = arith.constant dense<0.000000e+00> : vector<2x32xf32>
    %36 = tpu.matmul %35, %5, %cst_30 {dimension_numbers = #tpu.dot_dimension_numbers<[1], [0], [0], [1], [0, 0, 1, 1], [], []>} : vector<2x16xbf16>, vector<16x32xbf16>, vector<2x32xf32> -> vector<2x32xf32>
    %37 = vector.broadcast %6 : vector<1x32xf32> to vector<2x32xf32>
    %38 = arith.addf %36, %37 : vector<2x32xf32>
    %cst_31 = arith.constant 0.000000e+00 : f32
    %39 = vector.broadcast %cst_31 : f32 to vector<2x32xf32>
    %40 = arith.maximumf %38, %39 : vector<2x32xf32>
    %41 = arith.truncf %33 : vector<2x32xf32> to vector<2x32xbf16>
    %cst_32 = arith.constant dense<0.000000e+00> : vector<2x96xf32>
    %42 = tpu.matmul %41, %7, %cst_32 {dimension_numbers = #tpu.dot_dimension_numbers<[1], [0], [0], [1], [0, 0, 1, 1], [], []>} : vector<2x32xbf16>, vector<32x96xbf16>, vector<2x96xf32> -> vector<2x96xf32>
    %43 = arith.truncf %40 : vector<2x32xf32> to vector<2x32xbf16>
    %cst_33 = arith.constant dense<0.000000e+00> : vector<2x96xf32>
    %44 = tpu.matmul %43, %8, %cst_33 {dimension_numbers = #tpu.dot_dimension_numbers<[1], [0], [0], [1], [0, 0, 1, 1], [], []>} : vector<2x32xbf16>, vector<32x96xbf16>, vector<2x96xf32> -> vector<2x96xf32>
    %45 = arith.addf %42, %44 : vector<2x96xf32>
    %46 = vector.broadcast %9 : vector<1x96xf32> to vector<2x96xf32>
    %47 = arith.addf %45, %46 : vector<2x96xf32>
    %c2 = arith.constant 2 : index
    %c0_34 = arith.constant 0 : index
    %c0_35 = arith.constant 0 : index
    %48 = vector.load %arg4[%c2, %c0_34, %c0_35] : memref<3x16x32xbf16, #tpu.memory_space<vmem>>, vector<1x16x32xbf16>
    %49 = vector.shape_cast %48 : vector<1x16x32xbf16> to vector<16x32xbf16>
    %cst_36 = arith.constant dense<0.000000e+00> : vector<2x32xf32>
    %50 = tpu.matmul %3, %49, %cst_36 {dimension_numbers = #tpu.dot_dimension_numbers<[1], [0], [0], [1], [0, 0, 1, 1], [], []>} : vector<2x16xbf16>, vector<16x32xbf16>, vector<2x32xf32> -> vector<2x32xf32>
    %51 = vector.broadcast %4 : vector<2x1xf32> to vector<2x32xf32>
    %52 = arith.mulf %50, %51 : vector<2x32xf32>
    %c2_37 = arith.constant 2 : index
    %c0_38 = arith.constant 0 : index
    %c0_39 = arith.constant 0 : index
    %53 = vector.load %arg5[%c2_37, %c0_38, %c0_39] : memref<3x2x16xbf16, #tpu.memory_space<vmem>>, vector<1x2x16xbf16>
    %54 = vector.shape_cast %53 : vector<1x2x16xbf16> to vector<2x16xbf16>
    %cst_40 = arith.constant dense<0.000000e+00> : vector<2x32xf32>
    %55 = tpu.matmul %54, %5, %cst_40 {dimension_numbers = #tpu.dot_dimension_numbers<[1], [0], [0], [1], [0, 0, 1, 1], [], []>} : vector<2x16xbf16>, vector<16x32xbf16>, vector<2x32xf32> -> vector<2x32xf32>
    %56 = vector.broadcast %6 : vector<1x32xf32> to vector<2x32xf32>
    %57 = arith.addf %55, %56 : vector<2x32xf32>
    %cst_41 = arith.constant 0.000000e+00 : f32
    %58 = vector.broadcast %cst_41 : f32 to vector<2x32xf32>
    %59 = arith.maximumf %57, %58 : vector<2x32xf32>
    %60 = arith.truncf %52 : vector<2x32xf32> to vector<2x32xbf16>
    %cst_42 = arith.constant dense<0.000000e+00> : vector<2x96xf32>
    %61 = tpu.matmul %60, %7, %cst_42 {dimension_numbers = #tpu.dot_dimension_numbers<[1], [0], [0], [1], [0, 0, 1, 1], [], []>} : vector<2x32xbf16>, vector<32x96xbf16>, vector<2x96xf32> -> vector<2x96xf32>
    %62 = arith.truncf %59 : vector<2x32xf32> to vector<2x32xbf16>
    %cst_43 = arith.constant dense<0.000000e+00> : vector<2x96xf32>
    %63 = tpu.matmul %62, %8, %cst_43 {dimension_numbers = #tpu.dot_dimension_numbers<[1], [0], [0], [1], [0, 0, 1, 1], [], []>} : vector<2x32xbf16>, vector<32x96xbf16>, vector<2x96xf32> -> vector<2x96xf32>
    %64 = arith.addf %61, %63 : vector<2x96xf32>
    %65 = vector.broadcast %9 : vector<1x96xf32> to vector<2x96xf32>
    %66 = arith.addf %64, %65 : vector<2x96xf32>
    %c0_44 = arith.constant 0 : index
    %c0_45 = arith.constant 0 : index
    %67 = vector.load %arg10[%c0_44, %c0_45] : memref<32x96xbf16, #tpu.memory_space<vmem>>, vector<32x96xbf16>
    %c0_46 = arith.constant 0 : index
    %c0_47 = arith.constant 0 : index
    %68 = vector.load %arg12[%c0_46, %c0_47] : memref<1x96xf32, #tpu.memory_space<vmem>>, vector<1x96xf32>
    %c0_48 = arith.constant 0 : index
    %c0_49 = arith.constant 0 : index
    %69 = vector.load %arg15[%c0_48, %c0_49] : memref<2x32xf32, #tpu.memory_space<vmem>>, vector<2x32xf32>
    %70 = arith.truncf %69 : vector<2x32xf32> to vector<2x32xbf16>
    %cst_50 = arith.constant dense<0.000000e+00> : vector<2x96xf32>
    %71 = tpu.matmul %70, %67, %cst_50 {dimension_numbers = #tpu.dot_dimension_numbers<[1], [0], [0], [1], [0, 0, 1, 1], [], []>} : vector<2x32xbf16>, vector<32x96xbf16>, vector<2x96xf32> -> vector<2x96xf32>
    %72 = vector.broadcast %68 : vector<1x96xf32> to vector<2x96xf32>
    %73 = arith.addf %71, %72 : vector<2x96xf32>
    %74 = vector.extract_strided_slice %28 {offsets = [0, 0], sizes = [2, 32], strides = [1, 1]} : vector<2x96xf32> to vector<2x32xf32>
    %75 = vector.extract_strided_slice %73 {offsets = [0, 0], sizes = [2, 32], strides = [1, 1]} : vector<2x96xf32> to vector<2x32xf32>
    %76 = arith.addf %74, %75 : vector<2x32xf32>
    %77 = arith.negf %76 : vector<2x32xf32>
    %78 = math.exp %77 : vector<2x32xf32>
    %cst_51 = arith.constant 1.000000e+00 : f32
    %79 = vector.broadcast %cst_51 : f32 to vector<2x32xf32>
    %80 = arith.addf %79, %78 : vector<2x32xf32>
    %81 = arith.divf %79, %80 : vector<2x32xf32>
    %82 = vector.extract_strided_slice %28 {offsets = [0, 32], sizes = [2, 32], strides = [1, 1]} : vector<2x96xf32> to vector<2x32xf32>
    %83 = vector.extract_strided_slice %73 {offsets = [0, 32], sizes = [2, 32], strides = [1, 1]} : vector<2x96xf32> to vector<2x32xf32>
    %84 = arith.addf %82, %83 : vector<2x32xf32>
    %85 = arith.negf %84 : vector<2x32xf32>
    %86 = math.exp %85 : vector<2x32xf32>
    %cst_52 = arith.constant 1.000000e+00 : f32
    %87 = vector.broadcast %cst_52 : f32 to vector<2x32xf32>
    %88 = arith.addf %87, %86 : vector<2x32xf32>
    %89 = arith.divf %87, %88 : vector<2x32xf32>
    %90 = vector.extract_strided_slice %28 {offsets = [0, 64], sizes = [2, 32], strides = [1, 1]} : vector<2x96xf32> to vector<2x32xf32>
    %91 = vector.extract_strided_slice %73 {offsets = [0, 64], sizes = [2, 32], strides = [1, 1]} : vector<2x96xf32> to vector<2x32xf32>
    %92 = arith.mulf %81, %91 : vector<2x32xf32>
    %93 = arith.addf %90, %92 : vector<2x32xf32>
    %94 = math.tanh %93 : vector<2x32xf32>
    %cst_53 = arith.constant 1.000000e+00 : f32
    %95 = vector.broadcast %cst_53 : f32 to vector<2x32xf32>
    %96 = arith.subf %95, %89 : vector<2x32xf32>
    %97 = arith.mulf %96, %94 : vector<2x32xf32>
    %98 = arith.mulf %89, %69 : vector<2x32xf32>
    %99 = arith.addf %97, %98 : vector<2x32xf32>
    %c0_54 = arith.constant 0 : index
    %c0_55 = arith.constant 0 : index
    %c0_56 = arith.constant 0 : index
    %100 = vector.load %arg14[%c0_54, %c0_55, %c0_56] : memref<3x2x32xf32, #tpu.memory_space<vmem>>, vector<1x2x32xf32>
    %101 = vector.shape_cast %100 : vector<1x2x32xf32> to vector<2x32xf32>
    %102 = vector.shape_cast %99 : vector<2x32xf32> to vector<1x2x32xf32>
    tpu.vector_store %arg14[%c0_54, %c0_55, %c0_56], %102 {strides = array<i32>} : memref<3x2x32xf32, #tpu.memory_space<vmem>>, vector<1x2x32xf32>,
    %103 = arith.truncf %99 : vector<2x32xf32> to vector<2x32xbf16>
    %cst_57 = arith.constant dense<0.000000e+00> : vector<2x96xf32>
    %104 = tpu.matmul %103, %67, %cst_57 {dimension_numbers = #tpu.dot_dimension_numbers<[1], [0], [0], [1], [0, 0, 1, 1], [], []>} : vector<2x32xbf16>, vector<32x96xbf16>, vector<2x96xf32> -> vector<2x96xf32>
    %105 = vector.broadcast %68 : vector<1x96xf32> to vector<2x96xf32>
    %106 = arith.addf %104, %105 : vector<2x96xf32>
    %107 = vector.extract_strided_slice %47 {offsets = [0, 0], sizes = [2, 32], strides = [1, 1]} : vector<2x96xf32> to vector<2x32xf32>
    %108 = vector.extract_strided_slice %106 {offsets = [0, 0], sizes = [2, 32], strides = [1, 1]} : vector<2x96xf32> to vector<2x32xf32>
    %109 = arith.addf %107, %108 : vector<2x32xf32>
    %110 = arith.negf %109 : vector<2x32xf32>
    %111 = math.exp %110 : vector<2x32xf32>
    %cst_58 = arith.constant 1.000000e+00 : f32
    %112 = vector.broadcast %cst_58 : f32 to vector<2x32xf32>
    %113 = arith.addf %112, %111 : vector<2x32xf32>
    %114 = arith.divf %112, %113 : vector<2x32xf32>
    %115 = vector.extract_strided_slice %47 {offsets = [0, 32], sizes = [2, 32], strides = [1, 1]} : vector<2x96xf32> to vector<2x32xf32>
    %116 = vector.extract_strided_slice %106 {offsets = [0, 32], sizes = [2, 32], strides = [1, 1]} : vector<2x96xf32> to vector<2x32xf32>
    %117 = arith.addf %115, %116 : vector<2x32xf32>
    %118 = arith.negf %117 : vector<2x32xf32>
    %119 = math.exp %118 : vector<2x32xf32>
    %cst_59 = arith.constant 1.000000e+00 : f32
    %120 = vector.broadcast %cst_59 : f32 to vector<2x32xf32>
    %121 = arith.addf %120, %119 : vector<2x32xf32>
    %122 = arith.divf %120, %121 : vector<2x32xf32>
    %123 = vector.extract_strided_slice %47 {offsets = [0, 64], sizes = [2, 32], strides = [1, 1]} : vector<2x96xf32> to vector<2x32xf32>
    %124 = vector.extract_strided_slice %106 {offsets = [0, 64], sizes = [2, 32], strides = [1, 1]} : vector<2x96xf32> to vector<2x32xf32>
    %125 = arith.mulf %114, %124 : vector<2x32xf32>
    %126 = arith.addf %123, %125 : vector<2x32xf32>
    %127 = math.tanh %126 : vector<2x32xf32>
    %cst_60 = arith.constant 1.000000e+00 : f32
    %128 = vector.broadcast %cst_60 : f32 to vector<2x32xf32>
    %129 = arith.subf %128, %122 : vector<2x32xf32>
    %130 = arith.mulf %129, %127 : vector<2x32xf32>
    %131 = arith.mulf %122, %99 : vector<2x32xf32>
    %132 = arith.addf %130, %131 : vector<2x32xf32>
    %c1_61 = arith.constant 1 : index
    %c0_62 = arith.constant 0 : index
    %c0_63 = arith.constant 0 : index
    %133 = vector.load %arg14[%c1_61, %c0_62, %c0_63] : memref<3x2x32xf32, #tpu.memory_space<vmem>>, vector<1x2x32xf32>
    %134 = vector.shape_cast %133 : vector<1x2x32xf32> to vector<2x32xf32>
    %135 = vector.shape_cast %132 : vector<2x32xf32> to vector<1x2x32xf32>
    tpu.vector_store %arg14[%c1_61, %c0_62, %c0_63], %135 {strides = array<i32>} : memref<3x2x32xf32, #tpu.memory_space<vmem>>, vector<1x2x32xf32>,
    %136 = arith.truncf %132 : vector<2x32xf32> to vector<2x32xbf16>
    %cst_64 = arith.constant dense<0.000000e+00> : vector<2x96xf32>
    %137 = tpu.matmul %136, %67, %cst_64 {dimension_numbers = #tpu.dot_dimension_numbers<[1], [0], [0], [1], [0, 0, 1, 1], [], []>} : vector<2x32xbf16>, vector<32x96xbf16>, vector<2x96xf32> -> vector<2x96xf32>
    %138 = vector.broadcast %68 : vector<1x96xf32> to vector<2x96xf32>
    %139 = arith.addf %137, %138 : vector<2x96xf32>
    %140 = vector.extract_strided_slice %66 {offsets = [0, 0], sizes = [2, 32], strides = [1, 1]} : vector<2x96xf32> to vector<2x32xf32>
    %141 = vector.extract_strided_slice %139 {offsets = [0, 0], sizes = [2, 32], strides = [1, 1]} : vector<2x96xf32> to vector<2x32xf32>
    %142 = arith.addf %140, %141 : vector<2x32xf32>
    %143 = arith.negf %142 : vector<2x32xf32>
    %144 = math.exp %143 : vector<2x32xf32>
    %cst_65 = arith.constant 1.000000e+00 : f32
    %145 = vector.broadcast %cst_65 : f32 to vector<2x32xf32>
    %146 = arith.addf %145, %144 : vector<2x32xf32>
    %147 = arith.divf %145, %146 : vector<2x32xf32>
    %148 = vector.extract_strided_slice %66 {offsets = [0, 32], sizes = [2, 32], strides = [1, 1]} : vector<2x96xf32> to vector<2x32xf32>
    %149 = vector.extract_strided_slice %139 {offsets = [0, 32], sizes = [2, 32], strides = [1, 1]} : vector<2x96xf32> to vector<2x32xf32>
    %150 = arith.addf %148, %149 : vector<2x32xf32>
    %151 = arith.negf %150 : vector<2x32xf32>
    %152 = math.exp %151 : vector<2x32xf32>
    %cst_66 = arith.constant 1.000000e+00 : f32
    %153 = vector.broadcast %cst_66 : f32 to vector<2x32xf32>
    %154 = arith.addf %153, %152 : vector<2x32xf32>
    %155 = arith.divf %153, %154 : vector<2x32xf32>
    %156 = vector.extract_strided_slice %66 {offsets = [0, 64], sizes = [2, 32], strides = [1, 1]} : vector<2x96xf32> to vector<2x32xf32>
    %157 = vector.extract_strided_slice %139 {offsets = [0, 64], sizes = [2, 32], strides = [1, 1]} : vector<2x96xf32> to vector<2x32xf32>
    %158 = arith.mulf %147, %157 : vector<2x32xf32>
    %159 = arith.addf %156, %158 : vector<2x32xf32>
    %160 = math.tanh %159 : vector<2x32xf32>
    %cst_67 = arith.constant 1.000000e+00 : f32
    %161 = vector.broadcast %cst_67 : f32 to vector<2x32xf32>
    %162 = arith.subf %161, %155 : vector<2x32xf32>
    %163 = arith.mulf %162, %160 : vector<2x32xf32>
    %164 = arith.mulf %155, %132 : vector<2x32xf32>
    %165 = arith.addf %163, %164 : vector<2x32xf32>
    %c2_68 = arith.constant 2 : index
    %c0_69 = arith.constant 0 : index
    %c0_70 = arith.constant 0 : index
    %166 = vector.load %arg14[%c2_68, %c0_69, %c0_70] : memref<3x2x32xf32, #tpu.memory_space<vmem>>, vector<1x2x32xf32>
    %167 = vector.shape_cast %166 : vector<1x2x32xf32> to vector<2x32xf32>
    %168 = vector.shape_cast %165 : vector<2x32xf32> to vector<1x2x32xf32>
    tpu.vector_store %arg14[%c2_68, %c0_69, %c0_70], %168 {strides = array<i32>} : memref<3x2x32xf32, #tpu.memory_space<vmem>>, vector<1x2x32xf32>,
    %c0_71 = arith.constant 0 : index
    %c0_72 = arith.constant 0 : index
    %169 = vector.load %arg15[%c0_71, %c0_72] : memref<2x32xf32, #tpu.memory_space<vmem>>, vector<2x32xf32>
    tpu.vector_store %arg15[%c0_71, %c0_72], %165 {strides = array<i32>} : memref<2x32xf32, #tpu.memory_space<vmem>>, vector<2x32xf32>,
    return
  }
  func.func @transform_0(%arg0: i32, %arg1: i32) -> (i32, i32) {
    %c0_i32 = arith.constant 0 : i32
    %c0_i32_0 = arith.constant 0 : i32
    return %arg0, %c0_i32 : i32, i32
  }
  func.func @transform_1(%arg0: i32, %arg1: i32) -> (i32, i32) {
    %c0_i32 = arith.constant 0 : i32
    %c0_i32_0 = arith.constant 0 : i32
    return %arg0, %c0_i32 : i32, i32
  }
  func.func @transform_2(%arg0: i32, %arg1: i32) -> (i32, i32, i32) {
    %c0_i32 = arith.constant 0 : i32
    %c0_i32_0 = arith.constant 0 : i32
    %c0_i32_1 = arith.constant 0 : i32
    return %arg1, %c0_i32, %c0_i32_0 : i32, i32, i32
  }
  func.func @transform_3(%arg0: i32, %arg1: i32) -> (i32, i32, i32) {
    %c0_i32 = arith.constant 0 : i32
    %c0_i32_0 = arith.constant 0 : i32
    return %arg1, %arg0, %c0_i32 : i32, i32, i32
  }
  func.func @transform_4(%arg0: i32, %arg1: i32) -> (i32, i32) {
    %c0_i32 = arith.constant 0 : i32
    %c0_i32_0 = arith.constant 0 : i32
    %c0_i32_1 = arith.constant 0 : i32
    return %c0_i32, %c0_i32_0 : i32, i32
  }
  func.func @transform_5(%arg0: i32, %arg1: i32) -> (i32, i32) {
    %c0_i32 = arith.constant 0 : i32
    %c0_i32_0 = arith.constant 0 : i32
    %c0_i32_1 = arith.constant 0 : i32
    return %c0_i32, %c0_i32_0 : i32, i32
  }
  func.func @transform_6(%arg0: i32, %arg1: i32) -> (i32, i32) {
    %c0_i32 = arith.constant 0 : i32
    %c0_i32_0 = arith.constant 0 : i32
    %c0_i32_1 = arith.constant 0 : i32
    return %c0_i32, %c0_i32_0 : i32, i32
  }
  func.func @transform_7(%arg0: i32, %arg1: i32) -> (i32, i32) {
    %c0_i32 = arith.constant 0 : i32
    %c0_i32_0 = arith.constant 0 : i32
    %c0_i32_1 = arith.constant 0 : i32
    return %c0_i32, %c0_i32_0 : i32, i32
  }
  func.func @transform_8(%arg0: i32, %arg1: i32) -> (i32, i32) {
    %c0_i32 = arith.constant 0 : i32
    %c0_i32_0 = arith.constant 0 : i32
    %c0_i32_1 = arith.constant 0 : i32
    return %c0_i32, %c0_i32_0 : i32, i32
  }
  func.func @transform_9(%arg0: i32, %arg1: i32) -> (i32, i32) {
    %c0_i32 = arith.constant 0 : i32
    %c0_i32_0 = arith.constant 0 : i32
    %c0_i32_1 = arith.constant 0 : i32
    return %c0_i32, %c0_i32_0 : i32, i32
  }
  func.func @transform_10(%arg0: i32, %arg1: i32) -> (i32, i32) {
    %c0_i32 = arith.constant 0 : i32
    %c0_i32_0 = arith.constant 0 : i32
    %c0_i32_1 = arith.constant 0 : i32
    return %c0_i32, %c0_i32_0 : i32, i32
  }
  func.func @transform_11(%arg0: i32, %arg1: i32) -> (i32, i32) {
    %c0_i32 = arith.constant 0 : i32
    %c0_i32_0 = arith.constant 0 : i32
    return %arg0, %c0_i32 : i32, i32
  }
  func.func @transform_12(%arg0: i32, %arg1: i32) -> (i32, i32, i32) {
    %c0_i32 = arith.constant 0 : i32
    %c0_i32_0 = arith.constant 0 : i32
    return %arg1, %arg0, %c0_i32 : i32, i32, i32
  }
}

</mosaic_0001>

<bundles_post_ra>
// kernel: tpu_custom_call.1
= control target key start
LH: loop header
LB: loop body
LE: loop exit
PB: predicated region body
PF: predicated region fallthrough
CT: control target
= control target key end

     0   :  { %s2894_s0 = inlined_call_operand.vmem [shape: bf16[2,16], index: 0, kind: input, shape index: {}]   ;;  %s2895_s1 = inlined_call_operand.vmem [shape: f32[2,1], index: 1, kind: input, shape index: {}]   ;;  %s2896_s2 = inlined_call_operand.hbm [shape: bf16[9,16,32], index: 2, kind: input, shape index: {}]   ;;  %s2897_s3 = inlined_call_operand.hbm [shape: bf16[9,2,16], index: 3, kind: input, shape index: {}]   ;;  %s2898_s4 = inlined_call_operand.hbm [shape: bf16[16,32], index: 4, kind: input, shape index: {}]   ;;  %s2899_s5 = inlined_call_operand.hbm [shape: f32[1,32], index: 5, kind: input, shape index: {}]   ;;  %s2900_s6 = inlined_call_operand.hbm [shape: bf16[32,96], index: 6, kind: input, shape index: {}]   ;;  %s2901_s7 = inlined_call_operand.hbm [shape: bf16[32,96], index: 7, kind: input, shape index: {}]   ;;  %s2902_s8 = inlined_call_operand.vmem [shape: bf16[32,96], index: 8, kind: input, shape index: {}]   ;;  %s2903_s9 = inlined_call_operand.hbm [shape: f32[1,96], index: 9, kind: input, shape index: {}]   ;;  %s2904_s10 = inlined_call_operand.vmem [shape: f32[1,96], index: 10, kind: input, shape index: {}]   ;;  %s2905_s11 = inlined_call_operand.vmem [shape: f32[2,32], index: 11, kind: input, shape index: {}]   ;;  %s2906_s12 = inlined_call_operand.hbm [shape: f32[9,2,32], index: 12, kind: output, shape index: {}]  }
   0x1   :  { %2917 = sst [smem:[#allocation27_spill]] %s2896_s2 }
   0x2   :  { %2918 = sst [smem:[#allocation28_spill]] %s2898_s4 }
   0x3   :  { %2919 = sst [smem:[#allocation29_spill]] %s2899_s5 }
   0x4   :  { %2920 = sst [smem:[#allocation30_spill]] %s2900_s6 }
   0x5   :  { %2921 = sst [smem:[#allocation31_spill]] %s2901_s7 }
   0x6   :  { %2922 = sst [smem:[#allocation32_spill]] %s2902_s8 }
   0x7   :  { %2923 = sst [smem:[#allocation33_spill]] %s2903_s9 }
   0x8   :  { %2924 = sst [smem:[#allocation34_spill]] %s2904_s10 }
   0x9   :  { %2925 = sst [smem:[#allocation35_spill]] %s2906_s12 }
   0xa   :  { %17 = vsyncpa [#allocation4], 0 }
   0xb   :  { %19 = vsyncpa [#allocation4 + $0x1], 0 }
   0xc   :  { %20 = vsyncpa [#allocation7], 0 }
   0xd   :  { %22 = vsyncpa [#allocation7 + $0x1], 0 }
   0xe   :  { %23 = vsyncpa [#allocation10], 0 }
   0xf   :  { %24 = vsyncpa [#allocation13], 0 }
  0x10   :  { %25 = vsyncpa [#allocation5], 0 }
  0x11   :  { %27 = vsyncpa [#allocation5 + $0x1], 0  ;;  %s2458_s21 = smov 0   ;;  %s2460_s22 = smov 0  }
  0x12   :  { %s2462_s23 = smov 0   ;;  %s2464_s24 = smov 0  }
  0x13   :  { %s2466_s25 = smov 0   ;;  %s2468_s26 = smov 0  }
  0x14 LB: > { %2926 = sst [smem:[#allocation22_spill]] %s2352_s21  ;;  %s2489_s27 = sadd.s32 4294967295, %s2372_s26   ;;  %s2372_s26 = sphi %s2468_s26, %s33_s26   ;;  %s2368_s25 = sphi %s2466_s25, %s2966_s25   ;;  %s2364_s24 = sphi %s2464_s24, %s2965_s24   ;;  %s2360_s23 = sphi %s2462_s23, %s2961_s23   ;;  %s2356_s22 = sphi %s2460_s22, %s2964_s22   ;;  %s2352_s21 = sphi %s2458_s21, %s2963_s21  }
  0x15   : > { %2927 = sst [smem:[#allocation23_spill]] %s2360_s23  ;;  %p1713_p0 = scmp.ge.s32.totalorder %s2372_s26, 1 }
  0x16   : > { %p2909_p1 = scmp.eq.s32.totalorder %s2489_s27, 0  ;;  %p357_p2 = scmp.lt.s32.totalorder %s2372_s26, 4 }
  0x17   : > { %s2374_s29 = smov [#allocation8]   ;;  %s2375_s14 = smov [#allocation9]  }
  0x18   : > { %p2494_p3 = pnand %p1713_p0, %p357_p2  ;;  %s382_s30 = sshll.u32 %s2374_s29, 4  ;;  %s383_s30 = int_to_ptr.vmem [resolvable:$true] %s382_s30 }
  0x19   : > { %s396_s15 = sshll.u32 %s2375_s14, 4  ;;  %s2376_s16 = smov [#allocation12]   ;;  %s397_s15 = int_to_ptr.vmem [resolvable:$true] %s396_s15 }
  0x1a   : > { %s2928_s28 = scalar_select %p2494_p3, 1, 0 }
  0x1b   : > { %p1958_p4 = pneg %p2494_p3  ;;  %s419_s17 = sshll.u32 %s2376_s16, 4  ;;  %s420_s17 = int_to_ptr.vmem [resolvable:$true] %s419_s17 }
  0x1c   : > { %s2101_s19 = scalar_lea.vmem %s383_s30, 128  ;;  %p2109_p10 = scmp.lt.s32.totalorder %s383_s30, %s383_s30 }
  0x1d   : > { %p2502_p5 = pnand %p1958_p4, %p2909_p1  ;;  %p2102_p7 = scmp.ne.s32.totalorder %s383_s30, %s2101_s19 }
  0x1e   : > { %p2110_p11 = scmp.lt.s32.totalorder %s2101_s19, %s2101_s19 }
  0x1f   : > { %p2508_p6 = pneg %p2502_p5 }
  0x20   : > { %p2111_p12 = por %p2110_p11, %p2109_p10 }
  0x21   : > { %p2104_p8 = pnand %p2102_p7, %p2508_p6 }
  0x23   : > { %p2105_p9 = pneg %p2104_p8 }
  0x25   : > { %p2112_p13 = pnand %p2111_p12, %p2105_p9 }
  0x27   : > { %2115 = shalt.err (!%p2112_p13)
}
  0x28   : > { %s2911_s20 = smov 64   ;;  %s2912_s29 = smov 4  }
  0x29   : > { %s2931_s4 = sld [smem:[#allocation28_spill]]  ;;  %s2127_s12 = scalar_lea.vmem %s397_s15, 16 }
  0x2a   : > { %p2128_p0 = scmp.ne.s32.totalorder %s397_s15, %s2127_s12  ;;  %s2134_s19 = scalar_lea.vmem %s397_s15, 32 }
  0x2b   : > { %p2135_p7 = scmp.lt.s32.totalorder %s397_s15, %s397_s15  ;;  %p2136_p8 = scmp.lt.s32.totalorder %s2134_s19, %s2127_s12 }
  0x2c   : > { %p2130_p2 = pnand %p2128_p0, %p2508_p6 }
  0x2d   : > { %p2137_p9 = por %p2136_p8, %p2135_p7 }
  0x2e   : > { %p2131_p4 = pneg %p2130_p2 }
  0x2f   : > { %1961 = dma.hbm_to_vmem [thread:$0]  (!%p2502_p5), %s2931_s4, 128, %s383_s30, [#allocation7], %s2911_s20, %s2911_s20, %s2912_s29  }
  0x30   : > { %p2138_p10 = pnand %p2137_p9, %p2131_p4 }
  0x32   : > { %2141 = shalt.err (!%p2138_p10)
}
  0x33   : > { %s2932_s5 = sld [smem:[#allocation29_spill]]  ;;  %s2153_s30 = scalar_lea.vmem %s420_s17, 256 }
  0x34   : > { %p2154_p11 = scmp.ne.s32.totalorder %s420_s17, %s2153_s30  ;;  %p2161_p0 = scmp.lt.s32.totalorder %s420_s17, %s420_s17 }
  0x35   : > { %p2162_p2 = scmp.lt.s32.totalorder %s2153_s30, %s2153_s30 }
  0x36   : > { %p2156_p12 = pnand %p2154_p11, %p2508_p6 }
  0x37   : > { %p2163_p1 = por %p2162_p2, %p2161_p0 }
  0x38   : > { %p2157_p13 = pneg %p2156_p12 }
  0x39   : > { %1964 = dma.hbm_to_vmem [thread:$0]  (!%p2502_p5), %s2932_s5, 16, %s397_s15, [#allocation10]  }
  0x3a   : > { %p2164_p3 = pnand %p2163_p1, %p2157_p13 }
  0x3c   : > { %2167 = shalt.err (!%p2164_p3)
}
  0x3d   : > { %s2933_s7 = sld [smem:[#allocation31_spill]]  ;;  %s2379_s10 = smov [#allocation11]  }
  0x3e   : > { %s406_s15 = sshll.u32 %s2379_s10, 4  ;;  %s2380_s14 = smov [#allocation14]   ;;  %s407_s15 = int_to_ptr.vmem [resolvable:$true] %s406_s15 }
  0x3f   : > { %s436_s16 = sshll.u32 %s2380_s14, 4  ;;  %s2179_s19 = scalar_lea.vmem %s407_s15, 256  ;;  %s437_s16 = int_to_ptr.vmem [resolvable:$true] %s436_s16 }
  0x40   : > { %p2180_p4 = scmp.ne.s32.totalorder %s407_s15, %s2179_s19  ;;  %p2187_p7 = scmp.lt.s32.totalorder %s407_s15, %s407_s15 }
  0x41   : > { %p2188_p8 = scmp.lt.s32.totalorder %s2179_s19, %s2179_s19 }
  0x42   : > { %p2182_p1 = pnand %p2180_p4, %p2508_p6 }
  0x43   : > { %1970 = dma.hbm_to_vmem [thread:$0]  (!%p2502_p5), %s2933_s7, 256, %s420_s17, [#allocation13], %s2911_s20, %s2911_s20, %s2912_s29  }
  0x44   : > { %p2183_p3 = pneg %p2182_p1  ;;  %p2189_p9 = por %p2188_p8, %p2187_p7 }
  0x46   : > { %p2190_p10 = pnand %p2189_p9, %p2183_p3 }
  0x48   : > { %2193 = shalt.err (!%p2190_p10)
}
  0x49   : > { %s2934_s6 = sld [smem:[#allocation30_spill]]  ;;  %s2205_s12 = scalar_lea.vmem %s437_s16, 16 }
  0x4a   : > { %p2206_p11 = scmp.ne.s32.totalorder %s437_s16, %s2205_s12  ;;  %s2212_s8 = scalar_lea.vmem %s437_s16, 32 }
  0x4b   : > { %p2213_p0 = scmp.lt.s32.totalorder %s437_s16, %s437_s16  ;;  %p2214_p2 = scmp.lt.s32.totalorder %s2212_s8, %s2205_s12 }
  0x4c   : > { %p2208_p12 = pnand %p2206_p11, %p2508_p6 }
  0x4d   : > { %p2215_p4 = por %p2214_p2, %p2213_p0 }
  0x4e   : > { %p2209_p13 = pneg %p2208_p12 }
  0x4f   : > { %1967 = dma.hbm_to_vmem [thread:$0]  (!%p2502_p5), %s2934_s6, 256, %s407_s15, [#allocation10], %s2911_s20, %s2911_s20, %s2912_s29  }
  0x50   : > { %p2216_p1 = pnand %p2215_p4, %p2209_p13 }
  0x52   : > { %2219 = shalt.err (!%p2216_p1)
}
  0x53   : > { %s2935_s9 = sld [smem:[#allocation33_spill]]  ;;  %s1712_s18 = sadd.s32 4294967294, %s2372_s26  }
  0x54   : > { %s42_s15 = sadd.s32 1, %s2368_s25  ;;  %s104_s13 = sadd.s32 1, %s2360_s23 }
  0x55   : > { %p43_p6 = scmp.ge.s32.totalorder %s42_s15, 3  ;;  %p111_p3 = scmp.ne.s32.totalorder %s2360_s23, %s2356_s22 }
  0x56   : > { %p112_p7 = scmp.eq.s32.totalorder %s2372_s26, 0  ;;  %p117_p8 = scmp.ne.s32.totalorder %s2356_s22, %s2352_s21 }
  0x57   : > { %s2968_s15 = smov (%p43_p6, %s42_s15), 0  ;;  %p344_p11 = scmp.eq.s32.totalorder %s2489_s27, 2 }
  0x58   : > { %2936 = sst [smem:[#allocation24_spill]] %s2968_s15  ;;  %p2566_p9 = por %p112_p7, %p111_p3 }
  0x59   : > { %1973 = dma.hbm_to_vmem [thread:$0]  (!%p2502_p5), %s2935_s9, 16, %s437_s16, [#allocation13]  }
  0x5a   : > { %p2938_p5 = scmp.eq.s32.totalorder %s2489_s27, 0  ;;  %s101_s17 = ssub.s32 %s2368_s25, %s2968_s15 }
  0x5b   : > { %p102_p12 = scmp.eq.s32.totalorder %s101_s17, 0  ;;  %p350_p13 = scmp.eq.s32.totalorder %s1712_s18, 2 }
  0x5c   : > { %p2572_p10 = por %p2938_p5, %p117_p8  ;;  %p2579_p0 = por %p344_p11, %p111_p3 }
  0x5d   : > { %p1990_p2 = scmp.lt.s32.totalorder %s2372_s26, 3  ;;  %p2587_p4 = por %p350_p13, %p117_p8 }
  0x5e   : > { %s2585_s12 = scalar_select %p102_p12, %s2360_s23, %s104_s13  }
  0x5f   : > { %s2942_s8 = scalar_select %p2587_p4, 1, 0 }
  0x60   : > { %2941 = sst [smem:[#allocation25_spill]] %s2585_s12  ;;  %s2592_s10 = sand.u32 1, %s2360_s23  }
  0x61   : > { %2943 = sst [smem:[#allocation26_spill]] %s2942_s8  ;;  %s1927_s14 = smul.u32 24, %s2592_s10 }
  0x62   : > { %s1779_s20 = smul.u32 384, %s2368_s25  ;;  %p2598_p1 = pnand %p1990_p2, %p2566_p9 }
  0x63   : > { %s479_s17 = sand.u32 1, %s2372_s26   ;;  %s2945_s2 = sld [smem:[#allocation27_spill]] }
  0x64   : > { %s461_s5 = scalar_lea.vmem [#allocation3], %s1927_s14  ;;  %s458_s7 = scalar_lea.sflag [#allocation4], %s2592_s10 }
  0x65   : > { %s469_s6 = sshll.u32 %s461_s5, 4  ;;  %p2222_p6 = pneg %p2598_p1  ;;  %s470_s6 = int_to_ptr.vmem [resolvable:$true] %s469_s6 }
  0x66   : > { %s2233_s9 = scalar_lea.vmem %s470_s6, 384  ;;  %s2381_s19 = smov [#allocation3]  }
  0x67   : > { %p2234_p3 = scmp.ne.s32.totalorder %s470_s6, %s2233_s9  ;;  %s2238_s15 = sshll.u32 %s2381_s19, 4  ;;  %s2239_s15 = int_to_ptr.vmem [resolvable:$false] %s2238_s15 }
  0x68   : > { %s2240_s12 = scalar_lea.vmem %s2239_s15, 768  ;;  %p2241_p9 = scmp.lt.s32.totalorder %s470_s6, %s2239_s15 }
  0x69   : > { %s468_s4 = scalar_lea.hbm %s2945_s2, %s1779_s20  ;;  %p2236_p7 = pnand %p2234_p3, %p2222_p6 }
  0x6a   : > { %p2242_p5 = scmp.lt.s32.totalorder %s2240_s12, %s2233_s9 }
  0x6b   : > { %p2237_p8 = pneg %p2236_p7 }
  0x6c   : > { %p2243_p11 = por %p2242_p5, %p2241_p9 }
  0x6e   : > { %p2244_p12 = pnand %p2243_p11, %p2237_p8 }
  0x70   : > { %2247 = shalt.err (!%p2244_p12)
}
  0x71   : > { %s2946_s5 = smov 4   ;;  %s2947_s20 = smov 64  }
  0x72   : > { %1977 = dma.hbm_to_vmem [thread:$0]  (!%p2598_p1), %s468_s4, 384, %s470_s6, %s458_s7, %s2947_s20, %s2947_s20, %s2946_s5  }
  0x73   : > { %s1928_s29 = smul.u32 3, %s2592_s10  ;;  %s480_s12 = scalar_lea.sflag [#allocation7], %s479_s17 }
  0x74   : > { %s1777_s14 = smul.u32 48, %s2368_s25  ;;  %s2382_s8 = smov [#allocation6]  }
  0x75   : > { %s483_s15 = scalar_lea.vmem [#allocation6], %s1928_s29  ;;  %s2266_s21 = sshll.u32 %s2382_s8, 4  ;;  %s2267_s21 = int_to_ptr.vmem [resolvable:$false] %s2266_s21 }
  0x76   : > { %s490_s2 = scalar_lea.hbm %s2897_s3, %s1777_s14  ;;  %s491_s9 = sshll.u32 %s483_s15, 4  ;;  %s492_s9 = int_to_ptr.vmem [resolvable:$true] %s491_s9 }
  0x77   : > { %s2261_s23 = scalar_lea.vmem %s492_s9, 48  ;;  %s2268_s4 = scalar_lea.vmem %s2267_s21, 96 }
  0x78   : > { %p2262_p13 = scmp.ne.s32.totalorder %s492_s9, %s2261_s23  ;;  %p2269_p7 = scmp.lt.s32.totalorder %s492_s9, %s2267_s21 }
  0x79   : > { %p2270_p8 = scmp.lt.s32.totalorder %s2268_s4, %s2261_s23 }
  0x7a   : > { %p2264_p2 = pnand %p2262_p13, %p2222_p6 }
  0x7b   : > { %p2271_p9 = por %p2270_p8, %p2269_p7 }
  0x7c   : > { %p2265_p3 = pneg %p2264_p2 }
  0x7e   : > { %p2272_p5 = pnand %p2271_p9, %p2265_p3 }
  0x80   : > { %2275 = shalt.err (!%p2272_p5)
}
  0x81   : > { %s2383_s6 = smov 16   ;;  %s2384_s7 = smov 1  }
  0x82   : > { %1980 = dma.hbm_to_vmem [thread:$0]  (!%p2598_p1), %s490_s2, 48, %s492_s9, %s480_s12, %s2383_s6, %s2383_s6, %s2384_s7  }
  0x83   : > { %p2948_p11 = scmp.ne.s32.totalorder %s2928_s28, 0 }
  0x84   : > { %s2630_s10 = sand.u32 (!%p2948_p11), 1, %s2356_s22  }
  0x85   : > { %503 = sbr.rel (%p2948_p11) target bundleno = 2835 (0xb13), region = 68  ;;  %s506_s21 = scalar_lea.sflag (!%p2948_p11), [#allocation4], %s2630_s10 }
  0x86   : > { %s1929_s8 = smul.u32 (!%p2948_p11), 24, %s2630_s10 }
  0x88   : > { %s2634_s23 = scalar_lea.vmem (!%p2948_p11), [#allocation3], %s1929_s8 }
  0x8a   : > { %2327 = dma.done.wait (%p2572_p10), %s506_s21, 384  }
  0x8b   : > { %2329 = vsyncadd (%p2572_p10), %s506_s21, 4294966912  ;;  %s514_s2 = sand.u32 1, %s2489_s27   ;;  %s1930_s28 = smul.u32 3, %s2630_s10 }
  0x8c   : > { %s515_s18 = scalar_lea.sflag [#allocation7], %s514_s2 }
  0x8d   : > { %s2642_s17 = scalar_lea.vmem [#allocation6], %s1930_s28 }
  0x8e   : > { %2331 = dma.done.wait (%p2572_p10), %s515_s18, 48  }
  0x8f   : > { %2333 = vsyncadd (%p2572_p10), %s515_s18, 4294967248  ;;  %p2949_p1 = scmp.eq.s32.totalorder %s2489_s27, 0 }
  0x91   : > { %2335 = dma.done.wait (%p2949_p1), [#allocation7], 128   ;;  %p2950_p6 = pmov %p2949_p1 }
  0x92   : > { %p2951_p12 = pmov %p2949_p1 }
  0x93   : > { %2337 = vsyncadd (%p2950_p6), [#allocation7], 4294967168 }
  0x94   : > { %2339 = dma.done.wait (%p2951_p12), [#allocation10], 272   ;;  %p2952_p13 = pmov %p2949_p1 }
  0x95   : > { %p2953_p2 = pmov %p2949_p1 }
  0x96   : > { %2341 = vsyncadd (%p2952_p13), [#allocation10], 4294967024 }
  0x97   : > { %2343 = dma.done.wait (%p2953_p2), [#allocation13], 272   ;;  %p2954_p3 = pmov %p2949_p1 }
  0x98   : > { %s1931_s16 = smul.u32 6, %s2630_s10  ;;  %p1732_p10 = scmp.ne.s32.totalorder %s2364_s24, 0 }
  0x99   : > { %2345 = vsyncadd (%p2954_p3), [#allocation13], 4294967024 }
  0x9a   : > { %s2661_s5 = scalar_lea.vmem [#allocation15], %s1931_s16  ;;  %613 = sbr.rel (%p1732_p10) target bundleno = 161 (0xa1), region = 100 }
  0x9f   : > { %v614_v0 = vld [vmem:[%s2905_s11] sm:$0x3]  ;;  %vm615_vm0 = vcmask 254976  }
  0xa0   : > { %616 = vst.msk [vmem:[#allocation2] sm:$0x3] %vm615_vm0, %v614_v0 }
  0xa1 PF: > { %v2062_v1 = vld [vmem:[%s2634_s23] sm:$0xff]   ;;  %v2385_v2 = vmov 0.0   ;;  %vm2386_vm1 = vmmov 0   ;;  %vm639_vm2 = vcmask 130048   ;;  %v689_v5 = vld [vmem:[%s2642_s17] sm:$0x1] }
  0xa2   : > { %1819 = vmatprep.subr.bf16.mxu0 %v2385_v2  ;;  %1825 = vmatprep.subr.bf16.mxu1 %v2385_v2  ;;  %v2670_v3 = vld [vmem:[#allocation8] sm:$0xff]   ;;  %v2677_v4 = vld [vmem:[%s2894_s0] sm:$0x1]  ;;  %v2387_v7 = vmov 0   ;;  %v2687_v8 = vld [vmem:[#allocation11 + $0x8] sm:$0xff]   ;;  %vm760_vm3 = vcmask 261120  }
  0xa3   : > { %1820 = vmatpush3.bf16.msra.mxu0 %v2062_v1  ;;  %1821 = vmatprep.mubr.msk.bf16.mxu0 %vm2386_vm1, %v2385_v2  ;;  %v618_v6 = vld [vmem:[%s2895_s1] sm:$0x3]  ;;  %v2703_v10 = vld [vmem:[#allocation11] sm:$0xff]   ;;  %v2706_v11 = vld [vmem:[#allocation12] sm:$0xff]   ;;  %s2955_s12 = sld [smem:[#allocation32_spill]]  ;;  %s2389_s2 = smov 32  }
  0xa4   : > { %1826 = vmatpush3.bf16.msra.mxu1 %v2670_v3  ;;  %1827 = vmatprep.mubr.msk.bf16.mxu1 %vm2386_vm1, %v2385_v2  ;;  %v2691_v9 = vld [vmem:[#allocation12 + $0x8] sm:$0xff]   ;;  %v2068_v24 = vld [vmem:[%s2634_s23 + $0x8] sm:$0xff]   ;;  %v1749_v28 = vld [vmem:[%s2642_s17 + $0x1] sm:$0x1]  ;;  %s2956_s21 = sld [smem:[#allocation34_spill]]  ;;  %s2390_s28 = smov 96  }
  0xa5   : > { %2061 = vset.pattern.permute.xlu0 %v2387_v7  ;;  %1839 = vmatprep.subr.bf16.mxu1 %v2385_v2  ;;  %v2713_v13 = vld [vmem:[#allocation9] ss:$0 sm:$0xff]  ;;  %v2069_v44 = vld [vmem:[%s2634_s23 + $0x10] sm:$0xff]   ;;  %s2388_s23 = smov 64   ;;  %vm1338_vm4 = vcmask 254976   ;;  %s1778_s18 = smul.u32 96, %s2364_s24 }
  0xa6   : > { %1822 = vmatmul.mubr.msk.bf16.vlgmr.msra.gmra.mxu0 %vm639_vm2, %v2677_v4  ;;  %685 = vperm.xlu0 %2061, %v618_v6   ;;  %v1757_v52 = vld [vmem:[%s2642_s17 + $0x2] sm:$0x1]  ;;  %s1514_s17 = sshll.u32 %s2661_s5, 4  ;;  %s2957_s29 = sld [smem:[#allocation35_spill]]  ;;  %s2842_s17 = int_to_ptr.vmem [resolvable:$true] %s1514_s17 }
  0xa7   : > { %1828 = vmatmul.mubr.msk.bf16.vlgmr.msra.gmra.mxu1 %vm639_vm2, %v689_v5  ;;  %1831 = vmatprep.subr.bf16.mxu0 %v2385_v2  ;;  %s1500_s14 = scalar_lea.sflag [#allocation5], %s2630_s10  ;;  %s2276_s13 = scalar_lea.vmem %s2842_s17, 96 }
  0xa8   : > { %1840 = vmatpush3.bf16.msra.mxu1 %v2687_v8  ;;  %1832 = vmatpush3.bf16.msra.mxu0 %v2691_v9  ;;  %p2277_p7 = scmp.ne.s32.totalorder %s2842_s17, %s2276_s13  ;;  %s2391_s24 = smov [#allocation15]  }
  0xa9   : > { %1841 = vmatprep.subr.bf16.mxu1 %v2385_v2  ;;  %1833 = vmatprep.subr.bf16.mxu0 %v2385_v2  ;;  %v2070_v7 = vld [vmem:[%s2955_s12 + $0x8] sm:$0xff]   ;;  %s2280_s19 = sshll.u32 %s2391_s24, 4  ;;  %s2281_s19 = int_to_ptr.vmem [resolvable:$false] %s2280_s19 }
  0xaa   : > { %1843 = vmatprep.mubr.msk.bf16.mxu1 %vm2386_vm1, %v2385_v2  ;;  %1835 = vmatprep.mubr.msk.bf16.mxu0 %vm2386_vm1, %v2385_v2  ;;  %p2278_p8 = pnand %p2277_p7, %p2579_p0  ;;  %s2282_s15 = scalar_lea.vmem %s2281_s19, 192 }
  0xab   : > { %p2283_p5 = scmp.lt.s32.totalorder %s2842_s17, %s2281_s19  ;;  %p2284_p11 = scmp.lt.s32.totalorder %s2282_s15, %s2276_s13 }
  0xac   : > { %1842 = vmatpush3.bf16.msra.mxu1 %v2703_v10  ;;  %1834 = vmatpush3.bf16.msra.mxu0 %v2706_v11  ;;  %s2840_s27 = scalar_lea.hbm %s2957_s29, %s1778_s18  ;;  %p2279_p9 = pneg %p2278_p8 }
  0xad   : > { %1853 = vmatprep.subr.bf16.mxu1 %v2385_v2  ;;  %1847 = vmatprep.subr.bf16.mxu0 %v2385_v2  ;;  %p2285_p1 = por %p2284_p11, %p2283_p5 }
  0xaf   : > { %p2286_p6 = pnand %p2285_p1, %p2279_p9 }
 0x121   : > { %v2711_v12 = vpop.permute.xlu0 %685 }
 0x166   : > { %v677_v14 = vpop.f32.mrf.mxu0 }
 0x167   : > { %v739_v15 = vpop.f32.mrf.mxu1  ;;  %v688_v16 = vmul.f32 %v2711_v12, %v677_v14  ;;  %v1241_v14 = vld [vmem:[#allocation2] sm:$0x3] }
 0x168   : > { %v740_v17 = vadd.f32 %v2713_v13, %v739_v15  ;;  %v1823_v18 = vpop.f32.mrf.mxu0  ;;  %v1242_v15 = vpack.c.bf16 %v1241_v14, %v1241_v14 }
 0x169   : > { %v746_v19 = vpack.c.bf16 %v688_v16, %v688_v16  ;;  %v1829_v20 = vpop.f32.mrf.mxu1 }
 0x16a   : > { %v745_v21 = vmax.f32 %v740_v17, 0.0  ;;  %v680_v22 = vpop.f32.mrf.mxu0 }
 0x16b   : > { %v742_v23 = vpop.f32.mrf.mxu1  ;;  %1844 = vmatmul.mubr.msk.bf16.vlgmr.msra.gmra.mxu1 %vm760_vm3, %v746_v19 }
 0x16c   : > { %v747_v25 = vpack.c.bf16 %v745_v21, %v745_v21  ;;  %1854 = vmatpush3.bf16.msra.mxu1 %v2670_v3  ;;  %1855 = vmatprep.mubr.msk.bf16.mxu1 %vm2386_vm1, %v2385_v2  ;;  %v1824_v26 = vpop.f32.mrf.mxu0 }
 0x16d   : > { %v1830_v27 = vpop.f32.mrf.mxu1  ;;  %1867 = vmatprep.subr.bf16.mxu1 %v2385_v2 }
 0x16e   : > { %1836 = vmatmul.mubr.msk.bf16.vlgmr.msra.gmra.mxu0 %vm760_vm3, %v747_v25  ;;  %v2801_v25 = vld [vmem:[%s2956_s21] ss:$0 sm:$0xff] }
 0x16f   : > { %1848 = vmatpush3.bf16.msra.mxu0 %v2068_v24  ;;  %1849 = vmatprep.mubr.msk.bf16.mxu0 %vm2386_vm1, %v2385_v2 }
 0x170   : > { %1859 = vmatprep.subr.bf16.mxu0 %v2385_v2 }
 0x173   : > { %1856 = vmatmul.mubr.msk.bf16.vlgmr.msra.gmra.mxu1 %vm639_vm2, %v1749_v28 }
 0x174   : > { %1868 = vmatpush3.bf16.msra.mxu1 %v2687_v8  ;;  %1871 = vmatprep.mubr.msk.bf16.mxu1 %vm2386_vm1, %v2385_v2 }
 0x175   : > { %1869 = vmatprep.subr.bf16.mxu1 %v2385_v2 }
 0x176   : > { %1850 = vmatmul.mubr.msk.bf16.vlgmr.msra.gmra.mxu0 %vm639_vm2, %v2677_v4 }
 0x177   : > { %1860 = vmatpush3.bf16.msra.mxu0 %v2691_v9  ;;  %1863 = vmatprep.mubr.msk.bf16.mxu0 %vm2386_vm1, %v2385_v2 }
 0x178   : > { %1861 = vmatprep.subr.bf16.mxu0 %v2385_v2  ;;  %1870 = vmatpush3.bf16.msra.mxu1 %v2703_v10 }
 0x179   : > { %1881 = vmatprep.subr.bf16.mxu1 %v2385_v2 }
 0x17b   : > { %1862 = vmatpush3.bf16.msra.mxu0 %v2706_v11 }
 0x17c   : > { %1875 = vmatprep.subr.bf16.mxu0 %v2385_v2 }
 0x22b   : > { %v853_v29 = vpop.f32.mrf.mxu1 }
 0x22d   : > { %v1845_v30 = vpop.f32.mrf.mxu1 }
 0x22e   : > { %v798_v31 = vpop.f32.mrf.mxu0  ;;  %v2806_v30 = vld [vmem:[#allocation14] ss:$0 sm:$0xff] }
 0x22f   : > { %v2743_v32 = vadd.f32 %v853_v29, %v798_v31  ;;  %v856_v33 = vpop.f32.mrf.mxu1 }
 0x230   : > { %v1837_v34 = vpop.f32.mrf.mxu0 }
 0x231   : > { %v1846_v35 = vpop.f32.mrf.mxu1  ;;  %v865_v31 = vadd.f32 %v2806_v30, %v2743_v32 }
 0x232   : > { %v801_v36 = vpop.f32.mrf.mxu0 }
 0x233   : > { %v955_v37 = vpop.f32.mrf.mxu1 }
 0x234   : > { %v1838_v38 = vpop.f32.mrf.mxu0  ;;  %v956_v39 = vadd.f32 %v2713_v13, %v955_v37 }
 0x235   : > { %v1857_v40 = vpop.f32.mrf.mxu1 }
 0x236   : > { %v961_v41 = vmax.f32 %v956_v39, 0.0  ;;  %v909_v42 = vpop.f32.mrf.mxu0 }
 0x237   : > { %v915_v43 = vmul.f32 %v909_v42, %v2711_v12  ;;  %v958_v45 = vpop.f32.mrf.mxu1 }
 0x238   : > { %v963_v46 = vpack.c.bf16 %v961_v41, %v961_v41  ;;  %v1851_v47 = vpop.f32.mrf.mxu0 }
 0x239   : > { %v962_v48 = vpack.c.bf16 %v915_v43, %v915_v43  ;;  %v1858_v49 = vpop.f32.mrf.mxu1 }
 0x23a   : > { %v912_v50 = vpop.f32.mrf.mxu0  ;;  %1864 = vmatmul.mubr.msk.bf16.vlgmr.msra.gmra.mxu0 %vm760_vm3, %v963_v46 }
 0x23b   : > { %1872 = vmatmul.mubr.msk.bf16.vlgmr.msra.gmra.mxu1 %vm760_vm3, %v962_v48  ;;  %1876 = vmatpush3.bf16.msra.mxu0 %v2069_v44 }
 0x23c   : > { %1882 = vmatpush3.bf16.msra.mxu1 %v2670_v3  ;;  %v1852_v51 = vpop.f32.mrf.mxu0  ;;  %1877 = vmatprep.mubr.msk.bf16.mxu0 %vm2386_vm1, %v2385_v2 }
 0x23d   : > { %1883 = vmatprep.mubr.msk.bf16.mxu1 %vm2386_vm1, %v2385_v2  ;;  %1895 = vmatprep.subr.bf16.mxu1 %v2385_v2 }
 0x23e   : > { %1887 = vmatprep.subr.bf16.mxu0 %v2385_v2 }
 0x242   : > { %1878 = vmatmul.mubr.msk.bf16.vlgmr.msra.gmra.mxu0 %vm639_vm2, %v2677_v4 }
 0x243   : > { %1884 = vmatmul.mubr.msk.bf16.vlgmr.msra.gmra.mxu1 %vm639_vm2, %v1757_v52  ;;  %1888 = vmatpush3.bf16.msra.mxu0 %v2691_v9 }
 0x244   : > { %1896 = vmatpush3.bf16.msra.mxu1 %v2687_v8  ;;  %1889 = vmatprep.subr.bf16.mxu0 %v2385_v2 }
 0x245   : > { %1897 = vmatprep.subr.bf16.mxu1 %v2385_v2  ;;  %1899 = vmatprep.mubr.msk.bf16.mxu1 %vm2386_vm1, %v2385_v2 }
 0x246   : > { %1891 = vmatprep.mubr.msk.bf16.mxu0 %vm2386_vm1, %v2385_v2 }
 0x247   : > { %1890 = vmatpush3.bf16.msra.mxu0 %v2706_v11 }
 0x248   : > { %1898 = vmatpush3.bf16.msra.mxu1 %v2703_v10  ;;  %1903 = vmatprep.subr.bf16.mxu0 %v2385_v2 }
 0x249   : > { %1911 = vmatprep.subr.bf16.mxu1 %v2385_v2 }
 0x2fa   : > { %v1001_v53 = vpop.f32.mrf.mxu0 }
 0x2fb   : > { %v1044_v54 = vpop.f32.mrf.mxu1 }
 0x2fc   : > { %v2773_v55 = vadd.f32 %v1044_v54, %v1001_v53  ;;  %v1865_v56 = vpop.f32.mrf.mxu0 }
 0x2fd   : > { %v1873_v57 = vpop.f32.mrf.mxu1 }
 0x2fe   : > { %v1004_v58 = vpop.f32.mrf.mxu0  ;;  %v1050_v56 = vadd.f32 %v2806_v30, %v2773_v55 }
 0x2ff   : > { %v1047_v59 = vpop.f32.mrf.mxu1 }
 0x300   : > { %v1866_v60 = vpop.f32.mrf.mxu0 }
 0x301   : > { %v1874_v61 = vpop.f32.mrf.mxu1 }
 0x302   : > { %v1094_v62 = vpop.f32.mrf.mxu0 }
 0x303   : > { %v1100_v63 = vmul.f32 %v1094_v62, %v2711_v12  ;;  %v1140_v0 = vpop.f32.mrf.mxu1 }
 0x304   : > { %v1141_v1 = vadd.f32 %v2713_v13, %v1140_v0  ;;  %v1879_v3 = vpop.f32.mrf.mxu0  ;;  %v2071_v13 = vld [vmem:[%s2955_s12] sm:$0xff]  }
 0x305   : > { %v1147_v4 = vpack.c.bf16 %v1100_v63, %v1100_v63  ;;  %v1885_v5 = vpop.f32.mrf.mxu1 }
 0x306   : > { %v1146_v6 = vmax.f32 %v1141_v1, 0.0  ;;  %v1097_v8 = vpop.f32.mrf.mxu0 }
 0x307   : > { %v1143_v9 = vpop.f32.mrf.mxu1  ;;  %1900 = vmatmul.mubr.msk.bf16.vlgmr.msra.gmra.mxu1 %vm760_vm3, %v1147_v4 }
 0x308   : > { %v1148_v10 = vpack.c.bf16 %v1146_v6, %v1146_v6  ;;  %v1880_v11 = vpop.f32.mrf.mxu0  ;;  %1912 = vmatpush3.bf16.msra.mxu1 %v2070_v7  ;;  %1915 = vmatprep.mubr.msk.bf16.mxu1 %vm2386_vm1, %v2385_v2 }
 0x309   : > { %v1886_v12 = vpop.f32.mrf.mxu1  ;;  %1913 = vmatprep.subr.bf16.mxu1 %v2385_v2 }
 0x30a   : > { %1892 = vmatmul.mubr.msk.bf16.vlgmr.msra.gmra.mxu0 %vm760_vm3, %v1148_v10 }
 0x30b   : > { %1904 = vmatpush3.bf16.msra.mxu0 %v2070_v7  ;;  %1907 = vmatprep.mubr.msk.bf16.mxu0 %vm2386_vm1, %v2385_v2 }
 0x30c   : > { %1905 = vmatprep.subr.bf16.mxu0 %v2385_v2  ;;  %1914 = vmatpush3.bf16.msra.mxu1 %v2071_v13 }
 0x30f   : > { %1906 = vmatpush3.bf16.msra.mxu0 %v2071_v13 }
 0x310   : > { %1919 = vmatprep.subr.bf16.mxu0 %v2385_v2 }
 0x312   : > { %1908 = vmatmul.mubr.msk.bf16.vlgmr.msra.gmra.mxu0 %vm760_vm3, %v1242_v15 }
 0x313   : > { %1920 = vmatpush3.bf16.msra.mxu0 %v2070_v7  ;;  %1923 = vmatprep.mubr.msk.bf16.mxu0 %vm2386_vm1, %v2385_v2 }
 0x314   : > { %1921 = vmatprep.subr.bf16.mxu0 %v2385_v2 }
 0x317   : > { %1922 = vmatpush3.bf16.msra.mxu0 %v2071_v13 }
 0x3c7   : > { %v1229_v16 = vpop.f32.mrf.mxu1 }
 0x3c9   : > { %v1901_v17 = vpop.f32.mrf.mxu1 }
 0x3ca   : > { %v1186_v18 = vpop.f32.mrf.mxu0 }
 0x3cb   : > { %v2796_v19 = vadd.f32 %v1229_v16, %v1186_v18  ;;  %v1232_v20 = vpop.f32.mrf.mxu1 }
 0x3cc   : > { %v1893_v21 = vpop.f32.mrf.mxu0 }
 0x3cd   : > { %v1902_v22 = vpop.f32.mrf.mxu1  ;;  %v1235_v15 = vadd.f32 %v2806_v30, %v2796_v19 }
 0x3ce   : > { %v1189_v23 = vpop.f32.mrf.mxu0 }
 0x3d0   : > { %v1894_v24 = vpop.f32.mrf.mxu0 }
 0x3d2   : > { %v1298_v26 = vpop.f32.mrf.mxu0 }
 0x3d3   : > { %v1299_v27 = vadd.f32 %v2801_v25, %v1298_v26 }
 0x3d4   : > { %v1909_v2 = vpop.f32.mrf.mxu0 }
 0x3d5   : > { %1312 = vrot.lane.b32.xlu0 %v1299_v27, %s2388_s23  ;;  %v1304_v33 = vadd.f32 %v1299_v27, %v865_v31 }
 0x3d6   : > { %v1301_v28 = vpop.f32.mrf.mxu0 }
 0x3d7   : > { %v1765_v34 = vmul.f32 -1.442695, %v1304_v33 }
 0x3d8   : > { %v1910_v29 = vpop.f32.mrf.mxu0 }
 0x3d9   : > { %1329 = vrot.lane.b32.xlu0 %v1241_v14, %s2389_s2  ;;  %2072 = vpow2.f32 %v1765_v34 }
 0x3e6   : > { %v2073_v35 = vpop.eup %2072 }
 0x3e7   : > { %v1308_v36 = vadd.f32 1.0, %v2073_v35 }
 0x3e9   : > { %2074 = vrcp.f32 %v1308_v36 }
 0x3f6   : > { %v2075_v37 = vpop.eup %2074 }
 0x3f7   : > { %v1322_v32 = vsub.f32 1.0, %v2075_v37 }
 0x447   : > { %v1313_v38 = vpop.permute.xlu0 %1312 }
 0x448   : > { %v1315_v39 = vmul.f32 %v2075_v37, %v1313_v38 }
 0x44a   : > { %1317 = vrot.lane.b32.xlu1 %v1315_v39, %s2388_s23 }
 0x44b   : > { %v1330_v43 = vpop.permute.xlu0 %1329 }
 0x44c   : > { %v1332_v45 = vmul.f32 %v2075_v37, %v1330_v43 }
 0x4bc   : > { %v1318_v40 = vpop.permute.xlu1 %1317 }
 0x4bd   : > { %v1320_v41 = vadd.f32 %v1318_v40, %v865_v31 }
 0x4bf   : > { %2076 = vtanh.f32 %v1320_v41 }
 0x4cc   : > { %v2077_v42 = vpop.eup %2076 }
 0x4cd   : > { %1324 = vrot.lane.b32.xlu1 %v2077_v42, %s2390_s28 }
 0x53f   : > { %v1325_v44 = vpop.permute.xlu1 %1324 }
 0x540   : > { %v1327_v46 = vmul.f32 %v1325_v44, %v1322_v32 }
 0x542   : > { %v1333_v47 = vadd.f32 %v1332_v45, %v1327_v46 }
 0x544   : > { %v1340_v48 = vpack.c.bf16 %v1333_v47, %v1333_v47 }
 0x546   : > { %1342 = vrot.lane.b32.xlu1 %v1340_v48, %s2390_s28 }
 0x5b8   : > { %v1343_v49 = vpop.permute.xlu1 %1342 }
 0x5b9   : > { %1916 = vmatmul.mubr.msk.bf16.vlgmr.msra.gmra.mxu1 %vm760_vm3, %v1343_v49 }
 0x679   : > { %v1381_v50 = vpop.f32.mrf.mxu1 }
 0x67a   : > { %v1382_v51 = vadd.f32 %v2801_v25, %v1381_v50 }
 0x67b   : > { %v1917_v52 = vpop.f32.mrf.mxu1 }
 0x67c   : > { %1395 = vrot.lane.b32.xlu0 %v1382_v51, %s2388_s23  ;;  %v1387_v57 = vadd.f32 %v1382_v51, %v1050_v56 }
 0x67d   : > { %v1384_v53 = vpop.f32.mrf.mxu1 }
 0x67e   : > { %v1767_v58 = vmul.f32 -1.442695, %v1387_v57 }
 0x67f   : > { %v1918_v54 = vpop.f32.mrf.mxu1 }
 0x680   : > { %2078 = vpow2.f32 %v1767_v58 }
 0x68d   : > { %v2079_v59 = vpop.eup %2078 }
 0x68e   : > { %v1391_v60 = vadd.f32 1.0, %v2079_v59 }
 0x690   : > { %2080 = vrcp.f32 %v1391_v60 }
 0x69d   : > { %v2081_v61 = vpop.eup %2080 }
 0x69e   : > { %v1405_v4 = vsub.f32 1.0, %v2081_v61  ;;  %v1411_v55 = vmul.f32 %v2081_v61, %v1333_v47 }
 0x6ee   : > { %v1396_v62 = vpop.permute.xlu0 %1395 }
 0x6ef   : > { %v1398_v63 = vmul.f32 %v2081_v61, %v1396_v62 }
 0x6f1   : > { %1400 = vrot.lane.b32.xlu1 %v1398_v63, %s2388_s23 }
 0x763   : > { %v1401_v0 = vpop.permute.xlu1 %1400 }
 0x764   : > { %v1403_v1 = vadd.f32 %v1401_v0, %v1050_v56 }
 0x766   : > { %2082 = vtanh.f32 %v1403_v1 }
 0x773   : > { %v2083_v3 = vpop.eup %2082 }
 0x774   : > { %1407 = vrot.lane.b32.xlu0 %v2083_v3, %s2390_s28 }
 0x7e6   : > { %v1408_v5 = vpop.permute.xlu0 %1407 }
 0x7e7   : > { %v1410_v6 = vmul.f32 %v1408_v5, %v1405_v4 }
 0x7e9   : > { %v1412_v7 = vadd.f32 %v1411_v55, %v1410_v6 }
 0x7eb   : > { %v1419_v8 = vpack.c.bf16 %v1412_v7, %v1412_v7 }
 0x7ed   : > { %1421 = vrot.lane.b32.xlu1 %v1419_v8, %s2390_s28 }
 0x85f   : > { %v1422_v9 = vpop.permute.xlu1 %1421 }
 0x860   : > { %1924 = vmatmul.mubr.msk.bf16.vlgmr.msra.gmra.mxu0 %vm760_vm3, %v1422_v9 }
 0x920   : > { %v1460_v10 = vpop.f32.mrf.mxu0 }
 0x921   : > { %v1461_v11 = vadd.f32 %v2801_v25, %v1460_v10 }
 0x922   : > { %v1925_v12 = vpop.f32.mrf.mxu0 }
 0x923   : > { %1474 = vrot.lane.b32.xlu0 %v1461_v11, %s2388_s23  ;;  %v1466_v16 = vadd.f32 %v1461_v11, %v1235_v15 }
 0x924   : > { %v1463_v13 = vpop.f32.mrf.mxu0 }
 0x925   : > { %v1770_v17 = vmul.f32 -1.442695, %v1466_v16 }
 0x926   : > { %v1926_v14 = vpop.f32.mrf.mxu0 }
 0x927   : > { %2084 = vpow2.f32 %v1770_v17 }
 0x934   : > { %v2085_v18 = vpop.eup %2084 }
 0x935   : > { %v1470_v20 = vadd.f32 1.0, %v2085_v18 }
 0x937   : > { %2086 = vrcp.f32 %v1470_v20 }
 0x944   : > { %v2087_v21 = vpop.eup %2086 }
 0x945   : > { %v1484_v27 = vsub.f32 1.0, %v2087_v21  ;;  %v1490_v28 = vmul.f32 %v2087_v21, %v1412_v7 }
 0x995   : > { %v1475_v22 = vpop.permute.xlu0 %1474 }
 0x996   : > { %v1477_v23 = vmul.f32 %v2087_v21, %v1475_v22 }
 0x998   : > { %1479 = vrot.lane.b32.xlu1 %v1477_v23, %s2388_s23 }
 0x99c   : > { %1335 = vrot.lane.b32.xlu1 %v1333_v47, %s2390_s28 }
 0xa0a   : > { %v1480_v24 = vpop.permute.xlu1 %1479 }
 0xa0b   : > { %v1482_v25 = vadd.f32 %v1480_v24, %v1235_v15 }
 0xa0d   : > { %2088 = vtanh.f32 %v1482_v25 }
 0xa0e   : > { %v1336_v19 = vpop.permute.xlu1 %1335 }
 0xa0f   : > { %1339 = vst.msk [vmem:[%s2661_s5] sm:$0x3] %vm1338_vm4, %v1336_v19 }
 0xa1a   : > { %v2089_v26 = vpop.eup %2088 }
 0xa1b   : > { %1486 = vrot.lane.b32.xlu0 %v2089_v26, %s2390_s28 }
 0xa1f   : > { %1414 = vrot.lane.b32.xlu0 %v1412_v7, %s2390_s28 }
 0xa8d   : > { %v1487_v2 = vpop.permute.xlu0 %1486 }
 0xa8e   : > { %v1489_v29 = vmul.f32 %v1487_v2, %v1484_v27 }
 0xa90   : > { %v1491_v30 = vadd.f32 %v1490_v28, %v1489_v29 }
 0xa91   : > { %v1415_v31 = vpop.permute.xlu0 %1414 }
 0xa92   : > { %1768 = vst.msk [vmem:[%s2661_s5 + $0x2] sm:$0x3] %vm1338_vm4, %v1415_v31  ;;  %1493 = vrot.lane.b32.xlu1 %v1491_v30, %s2390_s28 }
 0xb04   : > { %v1494_v33 = vpop.permute.xlu1 %1493 }
 0xb05   : > { %1771 = vst.msk [vmem:[%s2661_s5 + $0x4] sm:$0x3] %vm1338_vm4, %v1494_v33  ;;  %1498 = vst.msk [vmem:[#allocation2] sm:$0x3] %vm1338_vm4, %v1494_v33 }
 0xb06   : > { %2289 = shalt.err (!%p2286_p6)
}
 0xb07   : > { %s2290_s5 = scalar_lea.hbm %s2840_s27, 96  ;;  %s2294_s6 = scalar_lea.hbm %s2957_s29, 288 }
 0xb08   : > { %p2291_p12 = scmp.ne.s32.totalorder %s2840_s27, %s2290_s5  ;;  %p2295_p3 = scmp.lt.s32.totalorder %s2840_s27, %s2957_s29 }
 0xb09   : > { %p2296_p10 = scmp.lt.s32.totalorder %s2294_s6, %s2290_s5 }
 0xb0a   : > { %p2292_p13 = pnand %p2291_p12, %p2579_p0 }
 0xb0b   : > { %p2297_p7 = por %p2296_p10, %p2295_p3 }
 0xb0c   : > { %p2293_p2 = pneg %p2292_p13 }
 0xb0e   : > { %p2298_p8 = pnand %p2297_p7, %p2293_p2 }
 0xb10   : > { %2301 = shalt.err (!%p2298_p8)
}
 0xb11   : > { %s2392_s21 = smov 2  }
 0xb12   : > { %1956 = dma.vmem_to_hbm [thread:$0]  (%p2579_p0), %s2842_s17, 96, %s2840_s27, %s1500_s14, %s2389_s2, %s2389_s2, %s2392_s21  }
 0xb13 PF: > { %s2958_s23 = sld [smem:[#allocation22_spill]]  ;;  %p1996_p9 = scmp.ge.s32.totalorder %s2372_s26, 2 }
 0xb15   : > { %p1982_p5 = pnand %p1996_p9, %p2587_p4 }
 0xb17   : > { %p1983_p11 = pneg %p1982_p5 }
 0xb19   : > { %s1529_s18 = sand.u32 1, %s2958_s23  }
 0xb1a   : > { %s1530_s16 = scalar_lea.sflag [#allocation5], %s1529_s18 }
 0xb1b   : > { %2347 = dma.done.wait (%p1983_p11), %s1530_s16, 96  }
 0xb1c   : > { %2349 = vsyncadd (%p1983_p11), %s1530_s16, 4294967200  ;;  %s33_s26 = sadd.s32 1, %s2372_s26   ;;  %s2960_s30 = sld [smem:[#allocation23_spill]] }
 0xb1d   : > { %p30_p1 = scmp.ge.s32.totalorder %s33_s26, 5   ;;  %s2961_s23 = sld [smem:[#allocation25_spill]] }
 0xb1e   : > { %s2962_s10 = sld [smem:[#allocation24_spill]]  ;;  %s2963_s21 = smov %s2356_s22 }
 0xb1f   : > { %s2965_s24 = smov %s2368_s25 }
 0xb20   :  { %32 = sbr.rel (!%p30_p1) target bundleno = 20 (0x14), region = 165 }
 0xb22   : > { %s2964_s22 = smov %s2960_s30 }
 0xb24   : > { %s2966_s25 = smov %s2962_s10 }
 0xb25   :  { %1535 = vsyncpa [#allocation4], 1 }
 0xb26   :  { %1537 = vsyncpa [#allocation4 + $0x1], 1 }
 0xb27   :  { %1538 = vsyncpa [#allocation7], 1 }
 0xb28   :  { %1540 = vsyncpa [#allocation7 + $0x1], 1 }
 0xb29   :  { %1541 = vsyncpa [#allocation10], 1 }
 0xb2a   :  { %1542 = vsyncpa [#allocation13], 1 }
 0xb2b   :  { %1543 = vsyncpa [#allocation5], 1 }
 0xb2c   :  { %1545 = vsyncpa [#allocation5 + $0x1], 1 }

</bundles_post_ra>
